<compile_context>
chip_gen: v6e
topology: v6e:2x2x1
jax: 0.10.0
libtpu: 0.0.40
codegen_flags: <defaults>
</compile_context>

<pallas_src>
import functools

import jax
import jax.numpy as jnp
from jax.experimental import pallas as pl
from jax.experimental.pallas import tpu as pltpu

LN_EPS = 1e-5


def _layernorm(x, gamma, beta):
    mu = jnp.mean(x, axis=-1, keepdims=True)
    var = jnp.mean(jnp.square(x - mu), axis=-1, keepdims=True)
    return (x - mu) * jax.lax.rsqrt(var + LN_EPS) * gamma + beta


def star_block_kernel(
    x_ref,                       # (tN, C)  f32 token tile (batch dim squeezed)
    wq_ref, wk_ref, wv_ref,      # (C, C)   bf16, pre-transposed: y = x @ W
    wp_ref, bp_ref,              # (C, C) bf16, (1, C) f32
    g1_ref, b1_ref,              # (1, C) f32  norm1
    g2_ref, b2_ref,              # (1, C) f32  norm2
    w1_ref, bf1_ref,             # (C, Hd) bf16, (1, Hd) f32  mlp fc1
    w2_ref, bf2_ref,             # (Hd, C) bf16, (1, C)  f32  mlp fc2
    s_ref,                       # (C, C) bf16: block-diag head-sum, scale folded in
    o_ref,                       # (tN, C) f32
    *, hd_chunk: int,
):
    f32 = jnp.float32
    bf16 = jnp.bfloat16

    x = x_ref[...]                                   # (tN, C) f32

    # ---- attention branch (elementwise in f32, MXU inputs in bf16) ----
    xn = _layernorm(x, g1_ref[...], b1_ref[...])
    xn_b = xn.astype(bf16)
    q = jnp.dot(xn_b, wq_ref[...], preferred_element_type=f32)
    k = jnp.dot(xn_b, wk_ref[...], preferred_element_type=f32)
    v = jnp.dot(xn_b, wv_ref[...], preferred_element_type=f32)

    t = jnp.tanh(q * k)                              # (tN, C) f32
    # per-head sum over head_dim broadcast back to each channel of the head;
    # the attention scale is pre-folded into S (bf16) in the wrapper.
    attn = jnp.dot(t.astype(bf16), s_ref[...], preferred_element_type=f32)
    y = attn * v                                     # (tN, C) f32
    y = jnp.dot(y.astype(bf16), wp_ref[...], preferred_element_type=f32) + bp_ref[...]

    x1 = x + y                                       # residual 1 (f32)

    # ---- MLP branch: hidden dim processed in static chunks ----
    xn2_b = _layernorm(x1, g2_ref[...], b2_ref[...]).astype(bf16)
    hd_total = w1_ref.shape[1]
    m = jnp.zeros_like(x1)                           # f32 accumulator (in vregs)
    for c0 in range(0, hd_total, hd_chunk):          # static -> fully unrolled
        sl = slice(c0, c0 + hd_chunk)
        h = jnp.dot(xn2_b, w1_ref[:, sl], preferred_element_type=f32) + bf1_ref[:, sl]
        h = jax.nn.gelu(h, approximate=True)         # tanh approx -> EUP slot
        m = m + jnp.dot(h.astype(bf16), w2_ref[sl, :], preferred_element_type=f32)

    # single lane-dense store per tile (residual 2 + fc2 bias)
    o_ref[...] = x1 + m + bf2_ref[...]


def _default_vmem_limit():
    try:
        cap = int(pltpu.get_tpu_info().vmem_capacity_bytes)
    except Exception:
        cap = 64 * 1024 * 1024
    # leave headroom under physical VMEM (v7x: 64 MiB), raise above the 32 MiB
    # scoped default on v5e/v6e (128 MiB physical).
    return min(cap - 8 * 1024 * 1024, 96 * 1024 * 1024)


def star_block(x, params, num_heads, *, token_tile=None, hd_chunk=None,
               vmem_limit_bytes=None):
    B, N, C = x.shape
    head_dim = C // num_heads
    Hd = params["w1"].shape[1]

    if token_tile is None:
        token_tile = N if N <= 512 else 512
    assert N % token_tile == 0, (N, token_tile)
    if hd_chunk is None:
        hd_chunk = Hd if Hd <= 512 else 512
    assert Hd % hd_chunk == 0, (Hd, hd_chunk)
    if vmem_limit_bytes is None:
        vmem_limit_bytes = _default_vmem_limit()

    # scale = dim // head_dim ** (-0.5)   (faithful to the PyTorch module:
    # Python floor-division of dim by head_dim**-0.5)
    scale = float(C // (head_dim ** (-0.5)))

    # block-diagonal head-sum matrix with the scale folded in:
    # S[c, c'] = scale if c, c' belong to the same head else 0.
    head_idx = jnp.arange(C) // head_dim
    S = jnp.where(head_idx[:, None] == head_idx[None, :], scale, 0.0)

    bf16 = jnp.bfloat16
    wq = params["wq"].astype(bf16)
    wk = params["wk"].astype(bf16)
    wv = params["wv"].astype(bf16)
    wp = params["wp"].astype(bf16)
    w1 = params["w1"].astype(bf16)
    w2 = params["w2"].astype(bf16)
    S = S.astype(bf16)

    tok_map = lambda b, t: (b, t, 0)
    full = lambda shape: pl.BlockSpec(shape, lambda b, t: (0,) * len(shape))

    # NOTE: weights use constant index_maps, so Pallas only DMAs them once
    # across the whole grid (no per-step re-fetch).
    grid_spec = pltpu.PrefetchScalarGridSpec(
        num_scalar_prefetch=0,
        grid=(B, N // token_tile),
        in_specs=[
            pl.BlockSpec((pl.Squeezed(), token_tile, C), tok_map),   # x
            full((C, C)), full((C, C)), full((C, C)),                # wq, wk, wv
            full((C, C)), full((1, C)),                              # wp, bp
            full((1, C)), full((1, C)),                              # g1, b1
            full((1, C)), full((1, C)),                              # g2, b2
            full((C, Hd)), full((1, Hd)),                            # w1, bf1
            full((Hd, C)), full((1, C)),                             # w2, bf2
            full((C, C)),                                            # S
        ],
        out_specs=pl.BlockSpec((pl.Squeezed(), token_tile, C), tok_map),
    )

    kernel = functools.partial(star_block_kernel, hd_chunk=hd_chunk)

    return pl.pallas_call(
        kernel,
        out_shape=jax.ShapeDtypeStruct((B, N, C), x.dtype),
        grid_spec=grid_spec,
        compiler_params=pltpu.CompilerParams(
            dimension_semantics=("parallel", "parallel"),
            vmem_limit_bytes=int(vmem_limit_bytes),
        ),
    )(
        x,
        wq, wk, wv,
        wp, params["bp"],
        params["g1"], params["b1"],
        params["g2"], params["b2"],
        w1, params["bf1"],
        w2, params["bf2"],
        S,
    )


def star_block_ref(x, params, num_heads):
    """Pure-JAX f32 reference mirroring the PyTorch module (exact-erf GELU)."""
    B, N, C = x.shape
    head_dim = C // num_heads
    scale = float(C // (head_dim ** (-0.5)))

    def attn(xn):
        q = xn @ params["wq"]
        k = xn @ params["wk"]
        v = xn @ params["wv"]
        qh = q.reshape(B, N, num_heads, head_dim).transpose(0, 2, 1, 3)
        kh = k.reshape(B, N, num_heads, head_dim).transpose(0, 2, 1, 3)
        vh = v.reshape(B, N, num_heads, head_dim).transpose(0, 2, 1, 3)
        a = jnp.tanh(qh * kh).sum(axis=-1, keepdims=True) * scale
        out = (a * vh).transpose(0, 2, 1, 3).reshape(B, N, C)
        return out @ params["wp"] + params["bp"]

    xn = _layernorm(x, params["g1"], params["b1"])
    x1 = x + attn(xn)
    xn2 = _layernorm(x1, params["g2"], params["b2"])
    h = jax.nn.gelu(xn2 @ params["w1"] + params["bf1"], approximate=False)
    return x1 + (h @ params["w2"] + params["bf2"])


def make_params(key, dim, hidden):
    ks = jax.random.split(key, 13)
    w_std, b_std = 0.01, 0.1
    nrm = lambda k, shape, s: jax.random.normal(k, shape, jnp.float32) * s
    return {
        "wq": nrm(ks[0], (dim, dim), w_std),
        "wk": nrm(ks[1], (dim, dim), w_std),
        "wv": nrm(ks[2], (dim, dim), w_std),
        "wp": nrm(ks[3], (dim, dim), w_std),
        "bp": nrm(ks[4], (1, dim), b_std),
        "g1": 1.0 + nrm(ks[5], (1, dim), b_std),
        "b1": nrm(ks[6], (1, dim), b_std),
        "g2": 1.0 + nrm(ks[7], (1, dim), b_std),
        "b2": nrm(ks[8], (1, dim), b_std),
        "w1": nrm(ks[9], (dim, hidden), w_std),
        "bf1": nrm(ks[10], (1, hidden), b_std),
        "w2": nrm(ks[11], (hidden, dim), w_std),
        "bf2": nrm(ks[12], (1, dim), b_std),
    }


if __name__ == "__main__":
    B, N, C = 2, 16, 128          # lane-dense C (multiple of 128)
    num_heads = 8
    mlp_ratio = 4.0
    hidden = int(C * mlp_ratio)   # 512

    key = jax.random.PRNGKey(0)
    kx, kp = jax.random.split(key)
    x = jax.random.normal(kx, (B, N, C), jnp.float32)
    params = make_params(kp, C, hidden)

    # token_tile=8 -> 2 token tiles per batch; hd_chunk=256 -> 2 MLP chunks,
    # exercising both new tiling paths.
    out = star_block(x, params, num_heads, token_tile=8, hd_chunk=256)
    out = jax.block_until_ready(out)

    ref = star_block_ref(x, params, num_heads)
    assert out.shape == (B, N, C)
    err = float(jnp.max(jnp.abs(out - ref)))
    # bf16 MXU inputs + tanh-GELU vs exact f32 reference: relaxed tolerance.
    assert jnp.allclose(out, ref, atol=3e-2, rtol=3e-2), err

    print("KERNEL_OK")
</pallas_src>

<mosaic_0001>
module attributes {stable_mosaic.version = 11 : i64} {
  func.func @star_block_kernel(%arg0: i32, %arg1: i32, %arg2: memref<1x8x128xf32, #tpu.memory_space<vmem>>, %arg3: memref<128x128xbf16, #tpu.memory_space<vmem>>, %arg4: memref<128x128xbf16, #tpu.memory_space<vmem>>, %arg5: memref<128x128xbf16, #tpu.memory_space<vmem>>, %arg6: memref<128x128xbf16, #tpu.memory_space<vmem>>, %arg7: memref<1x128xf32, #tpu.memory_space<vmem>>, %arg8: memref<1x128xf32, #tpu.memory_space<vmem>>, %arg9: memref<1x128xf32, #tpu.memory_space<vmem>>, %arg10: memref<1x128xf32, #tpu.memory_space<vmem>>, %arg11: memref<1x128xf32, #tpu.memory_space<vmem>>, %arg12: memref<128x512xbf16, #tpu.memory_space<vmem>>, %arg13: memref<1x512xf32, #tpu.memory_space<vmem>>, %arg14: memref<512x128xbf16, #tpu.memory_space<vmem>>, %arg15: memref<1x128xf32, #tpu.memory_space<vmem>>, %arg16: memref<128x128xbf16, #tpu.memory_space<vmem>>, %arg17: memref<1x8x128xf32, #tpu.memory_space<vmem>>) attributes {dimension_semantics = [#tpu.dimension_semantics<parallel>, #tpu.dimension_semantics<parallel>], iteration_bounds = array<i64: 2, 2>, scalar_prefetch = 0 : i64, scratch_operands = 0 : i64, tpu.core_type = #tpu.core_type<tc>, window_params = [{transform_indices = @transform_0, window_bounds = array<i64: 1, 8, 128>}, {pipeline_mode = #tpu.pipeline_mode<synchronous>, transform_indices = @transform_1, window_bounds = array<i64: 128, 128>}, {pipeline_mode = #tpu.pipeline_mode<synchronous>, transform_indices = @transform_2, window_bounds = array<i64: 128, 128>}, {pipeline_mode = #tpu.pipeline_mode<synchronous>, transform_indices = @transform_3, window_bounds = array<i64: 128, 128>}, {pipeline_mode = #tpu.pipeline_mode<synchronous>, transform_indices = @transform_4, window_bounds = array<i64: 128, 128>}, {pipeline_mode = #tpu.pipeline_mode<synchronous>, transform_indices = @transform_5, window_bounds = array<i64: 1, 128>}, {pipeline_mode = #tpu.pipeline_mode<synchronous>, transform_indices = @transform_6, window_bounds = array<i64: 1, 128>}, {pipeline_mode = #tpu.pipeline_mode<synchronous>, transform_indices = @transform_7, window_bounds = array<i64: 1, 128>}, {pipeline_mode = #tpu.pipeline_mode<synchronous>, transform_indices = @transform_8, window_bounds = array<i64: 1, 128>}, {pipeline_mode = #tpu.pipeline_mode<synchronous>, transform_indices = @transform_9, window_bounds = array<i64: 1, 128>}, {pipeline_mode = #tpu.pipeline_mode<synchronous>, transform_indices = @transform_10, window_bounds = array<i64: 128, 512>}, {pipeline_mode = #tpu.pipeline_mode<synchronous>, transform_indices = @transform_11, window_bounds = array<i64: 1, 512>}, {pipeline_mode = #tpu.pipeline_mode<synchronous>, transform_indices = @transform_12, window_bounds = array<i64: 512, 128>}, {pipeline_mode = #tpu.pipeline_mode<synchronous>, transform_indices = @transform_13, window_bounds = array<i64: 1, 128>}, {pipeline_mode = #tpu.pipeline_mode<synchronous>, transform_indices = @transform_14, window_bounds = array<i64: 128, 128>}, {transform_indices = @transform_15, window_bounds = array<i64: 1, 8, 128>}]} {
    %c0 = arith.constant 0 : index
    %c0_0 = arith.constant 0 : index
    %c0_1 = arith.constant 0 : index
    %0 = vector.load %arg2[%c0, %c0_0, %c0_1] : memref<1x8x128xf32, #tpu.memory_space<vmem>>, vector<1x8x128xf32>
    %1 = vector.shape_cast %0 : vector<1x8x128xf32> to vector<8x128xf32>
    %c0_2 = arith.constant 0 : index
    %c0_3 = arith.constant 0 : index
    %2 = vector.load %arg8[%c0_2, %c0_3] : memref<1x128xf32, #tpu.memory_space<vmem>>, vector<1x128xf32>
    %c0_4 = arith.constant 0 : index
    %c0_5 = arith.constant 0 : index
    %3 = vector.load %arg9[%c0_4, %c0_5] : memref<1x128xf32, #tpu.memory_space<vmem>>, vector<1x128xf32>
    %cst = arith.constant dense<0.000000e+00> : vector<8xf32>
    %4 = vector.multi_reduction <add>, %1, %cst [1] : vector<8x128xf32> to vector<8xf32>
    %5 = vector.shape_cast %4 : vector<8xf32> to vector<8x1xf32>
    %cst_6 = arith.constant 1.280000e+02 : f32
    %6 = vector.broadcast %cst_6 : f32 to vector<8x1xf32>
    %7 = arith.divf %5, %6 : vector<8x1xf32>
    %8 = vector.broadcast %7 : vector<8x1xf32> to vector<8x128xf32>
    %9 = arith.subf %1, %8 : vector<8x128xf32>
    %10 = arith.mulf %9, %9 : vector<8x128xf32>
    %cst_7 = arith.constant dense<0.000000e+00> : vector<8xf32>
    %11 = vector.multi_reduction <add>, %10, %cst_7 [1] : vector<8x128xf32> to vector<8xf32>
    %12 = vector.shape_cast %11 : vector<8xf32> to vector<8x1xf32>
    %cst_8 = arith.constant 1.280000e+02 : f32
    %13 = vector.broadcast %cst_8 : f32 to vector<8x1xf32>
    %14 = arith.divf %12, %13 : vector<8x1xf32>
    %15 = vector.broadcast %7 : vector<8x1xf32> to vector<8x128xf32>
    %16 = arith.subf %1, %15 : vector<8x128xf32>
    %cst_9 = arith.constant 9.99999974E-6 : f32
    %17 = vector.broadcast %cst_9 : f32 to vector<8x1xf32>
    %18 = arith.addf %14, %17 : vector<8x1xf32>
    %19 = math.rsqrt %18 : vector<8x1xf32>
    %20 = vector.broadcast %19 : vector<8x1xf32> to vector<8x128xf32>
    %21 = arith.mulf %16, %20 : vector<8x128xf32>
    %22 = vector.broadcast %2 : vector<1x128xf32> to vector<8x128xf32>
    %23 = arith.mulf %21, %22 : vector<8x128xf32>
    %24 = vector.broadcast %3 : vector<1x128xf32> to vector<8x128xf32>
    %25 = arith.addf %23, %24 : vector<8x128xf32>
    %26 = arith.truncf %25 : vector<8x128xf32> to vector<8x128xbf16>
    %c0_10 = arith.constant 0 : index
    %c0_11 = arith.constant 0 : index
    %27 = vector.load %arg3[%c0_10, %c0_11] : memref<128x128xbf16, #tpu.memory_space<vmem>>, vector<128x128xbf16>
    %cst_12 = arith.constant dense<0.000000e+00> : vector<8x128xf32>
    %28 = tpu.matmul %26, %27, %cst_12 {dimension_numbers = #tpu.dot_dimension_numbers<[1], [0], [0], [1], [0, 0, 1, 1], [], []>} : vector<8x128xbf16>, vector<128x128xbf16>, vector<8x128xf32> -> vector<8x128xf32>
    %c0_13 = arith.constant 0 : index
    %c0_14 = arith.constant 0 : index
    %29 = vector.load %arg4[%c0_13, %c0_14] : memref<128x128xbf16, #tpu.memory_space<vmem>>, vector<128x128xbf16>
    %cst_15 = arith.constant dense<0.000000e+00> : vector<8x128xf32>
    %30 = tpu.matmul %26, %29, %cst_15 {dimension_numbers = #tpu.dot_dimension_numbers<[1], [0], [0], [1], [0, 0, 1, 1], [], []>} : vector<8x128xbf16>, vector<128x128xbf16>, vector<8x128xf32> -> vector<8x128xf32>
    %c0_16 = arith.constant 0 : index
    %c0_17 = arith.constant 0 : index
    %31 = vector.load %arg5[%c0_16, %c0_17] : memref<128x128xbf16, #tpu.memory_space<vmem>>, vector<128x128xbf16>
    %cst_18 = arith.constant dense<0.000000e+00> : vector<8x128xf32>
    %32 = tpu.matmul %26, %31, %cst_18 {dimension_numbers = #tpu.dot_dimension_numbers<[1], [0], [0], [1], [0, 0, 1, 1], [], []>} : vector<8x128xbf16>, vector<128x128xbf16>, vector<8x128xf32> -> vector<8x128xf32>
    %33 = arith.mulf %28, %30 : vector<8x128xf32>
    %34 = math.tanh %33 : vector<8x128xf32>
    %35 = arith.truncf %34 : vector<8x128xf32> to vector<8x128xbf16>
    %c0_19 = arith.constant 0 : index
    %c0_20 = arith.constant 0 : index
    %36 = vector.load %arg16[%c0_19, %c0_20] : memref<128x128xbf16, #tpu.memory_space<vmem>>, vector<128x128xbf16>
    %cst_21 = arith.constant dense<0.000000e+00> : vector<8x128xf32>
    %37 = tpu.matmul %35, %36, %cst_21 {dimension_numbers = #tpu.dot_dimension_numbers<[1], [0], [0], [1], [0, 0, 1, 1], [], []>} : vector<8x128xbf16>, vector<128x128xbf16>, vector<8x128xf32> -> vector<8x128xf32>
    %38 = arith.mulf %37, %32 : vector<8x128xf32>
    %39 = arith.truncf %38 : vector<8x128xf32> to vector<8x128xbf16>
    %c0_22 = arith.constant 0 : index
    %c0_23 = arith.constant 0 : index
    %40 = vector.load %arg6[%c0_22, %c0_23] : memref<128x128xbf16, #tpu.memory_space<vmem>>, vector<128x128xbf16>
    %cst_24 = arith.constant dense<0.000000e+00> : vector<8x128xf32>
    %41 = tpu.matmul %39, %40, %cst_24 {dimension_numbers = #tpu.dot_dimension_numbers<[1], [0], [0], [1], [0, 0, 1, 1], [], []>} : vector<8x128xbf16>, vector<128x128xbf16>, vector<8x128xf32> -> vector<8x128xf32>
    %c0_25 = arith.constant 0 : index
    %c0_26 = arith.constant 0 : index
    %42 = vector.load %arg7[%c0_25, %c0_26] : memref<1x128xf32, #tpu.memory_space<vmem>>, vector<1x128xf32>
    %43 = vector.broadcast %42 : vector<1x128xf32> to vector<8x128xf32>
    %44 = arith.addf %41, %43 : vector<8x128xf32>
    %45 = arith.addf %1, %44 : vector<8x128xf32>
    %c0_27 = arith.constant 0 : index
    %c0_28 = arith.constant 0 : index
    %46 = vector.load %arg10[%c0_27, %c0_28] : memref<1x128xf32, #tpu.memory_space<vmem>>, vector<1x128xf32>
    %c0_29 = arith.constant 0 : index
    %c0_30 = arith.constant 0 : index
    %47 = vector.load %arg11[%c0_29, %c0_30] : memref<1x128xf32, #tpu.memory_space<vmem>>, vector<1x128xf32>
    %cst_31 = arith.constant dense<0.000000e+00> : vector<8xf32>
    %48 = vector.multi_reduction <add>, %45, %cst_31 [1] : vector<8x128xf32> to vector<8xf32>
    %49 = vector.shape_cast %48 : vector<8xf32> to vector<8x1xf32>
    %cst_32 = arith.constant 1.280000e+02 : f32
    %50 = vector.broadcast %cst_32 : f32 to vector<8x1xf32>
    %51 = arith.divf %49, %50 : vector<8x1xf32>
    %52 = vector.broadcast %51 : vector<8x1xf32> to vector<8x128xf32>
    %53 = arith.subf %45, %52 : vector<8x128xf32>
    %54 = arith.mulf %53, %53 : vector<8x128xf32>
    %cst_33 = arith.constant dense<0.000000e+00> : vector<8xf32>
    %55 = vector.multi_reduction <add>, %54, %cst_33 [1] : vector<8x128xf32> to vector<8xf32>
    %56 = vector.shape_cast %55 : vector<8xf32> to vector<8x1xf32>
    %cst_34 = arith.constant 1.280000e+02 : f32
    %57 = vector.broadcast %cst_34 : f32 to vector<8x1xf32>
    %58 = arith.divf %56, %57 : vector<8x1xf32>
    %59 = vector.broadcast %51 : vector<8x1xf32> to vector<8x128xf32>
    %60 = arith.subf %45, %59 : vector<8x128xf32>
    %cst_35 = arith.constant 9.99999974E-6 : f32
    %61 = vector.broadcast %cst_35 : f32 to vector<8x1xf32>
    %62 = arith.addf %58, %61 : vector<8x1xf32>
    %63 = math.rsqrt %62 : vector<8x1xf32>
    %64 = vector.broadcast %63 : vector<8x1xf32> to vector<8x128xf32>
    %65 = arith.mulf %60, %64 : vector<8x128xf32>
    %66 = vector.broadcast %46 : vector<1x128xf32> to vector<8x128xf32>
    %67 = arith.mulf %65, %66 : vector<8x128xf32>
    %68 = vector.broadcast %47 : vector<1x128xf32> to vector<8x128xf32>
    %69 = arith.addf %67, %68 : vector<8x128xf32>
    %70 = arith.truncf %69 : vector<8x128xf32> to vector<8x128xbf16>
    %cst_36 = arith.constant 0.000000e+00 : f32
    %71 = vector.broadcast %cst_36 : f32 to vector<8x128xf32>
    %c0_37 = arith.constant 0 : index
    %c0_38 = arith.constant 0 : index
    %72 = vector.load %arg12[%c0_37, %c0_38] : memref<128x512xbf16, #tpu.memory_space<vmem>>, vector<128x256xbf16>
    %cst_39 = arith.constant dense<0.000000e+00> : vector<8x256xf32>
    %73 = tpu.matmul %70, %72, %cst_39 {dimension_numbers = #tpu.dot_dimension_numbers<[1], [0], [0], [1], [0, 0, 1, 1], [], []>} : vector<8x128xbf16>, vector<128x256xbf16>, vector<8x256xf32> -> vector<8x256xf32>
    %c0_40 = arith.constant 0 : index
    %c0_41 = arith.constant 0 : index
    %74 = vector.load %arg13[%c0_40, %c0_41] : memref<1x512xf32, #tpu.memory_space<vmem>>, vector<1x256xf32>
    %75 = vector.broadcast %74 : vector<1x256xf32> to vector<8x256xf32>
    %76 = arith.addf %73, %75 : vector<8x256xf32>
    %77 = arith.mulf %76, %76 : vector<8x256xf32>
    %78 = arith.mulf %76, %77 : vector<8x256xf32>
    %cst_42 = arith.constant 4.471500e-02 : f32
    %79 = vector.broadcast %cst_42 : f32 to vector<8x256xf32>
    %80 = arith.mulf %79, %78 : vector<8x256xf32>
    %81 = arith.addf %76, %80 : vector<8x256xf32>
    %cst_43 = arith.constant 0.797884583 : f32
    %82 = vector.broadcast %cst_43 : f32 to vector<8x256xf32>
    %83 = arith.mulf %82, %81 : vector<8x256xf32>
    %84 = math.tanh %83 : vector<8x256xf32>
    %cst_44 = arith.constant 1.000000e+00 : f32
    %85 = vector.broadcast %cst_44 : f32 to vector<8x256xf32>
    %86 = arith.addf %85, %84 : vector<8x256xf32>
    %cst_45 = arith.constant 5.000000e-01 : f32
    %87 = vector.broadcast %cst_45 : f32 to vector<8x256xf32>
    %88 = arith.mulf %87, %86 : vector<8x256xf32>
    %89 = arith.mulf %76, %88 : vector<8x256xf32>
    %90 = arith.truncf %89 : vector<8x256xf32> to vector<8x256xbf16>
    %c0_46 = arith.constant 0 : index
    %c0_47 = arith.constant 0 : index
    %91 = vector.load %arg14[%c0_46, %c0_47] : memref<512x128xbf16, #tpu.memory_space<vmem>>, vector<256x128xbf16>
    %cst_48 = arith.constant dense<0.000000e+00> : vector<8x128xf32>
    %92 = tpu.matmul %90, %91, %cst_48 {dimension_numbers = #tpu.dot_dimension_numbers<[1], [0], [0], [1], [0, 0, 1, 1], [], []>} : vector<8x256xbf16>, vector<256x128xbf16>, vector<8x128xf32> -> vector<8x128xf32>
    %93 = arith.addf %71, %92 : vector<8x128xf32>
    %c0_49 = arith.constant 0 : index
    %c256 = arith.constant 256 : index
    %94 = vector.load %arg12[%c0_49, %c256] : memref<128x512xbf16, #tpu.memory_space<vmem>>, vector<128x256xbf16>
    %cst_50 = arith.constant dense<0.000000e+00> : vector<8x256xf32>
    %95 = tpu.matmul %70, %94, %cst_50 {dimension_numbers = #tpu.dot_dimension_numbers<[1], [0], [0], [1], [0, 0, 1, 1], [], []>} : vector<8x128xbf16>, vector<128x256xbf16>, vector<8x256xf32> -> vector<8x256xf32>
    %c0_51 = arith.constant 0 : index
    %c256_52 = arith.constant 256 : index
    %96 = vector.load %arg13[%c0_51, %c256_52] : memref<1x512xf32, #tpu.memory_space<vmem>>, vector<1x256xf32>
    %97 = vector.broadcast %96 : vector<1x256xf32> to vector<8x256xf32>
    %98 = arith.addf %95, %97 : vector<8x256xf32>
    %99 = arith.mulf %98, %98 : vector<8x256xf32>
    %100 = arith.mulf %98, %99 : vector<8x256xf32>
    %cst_53 = arith.constant 4.471500e-02 : f32
    %101 = vector.broadcast %cst_53 : f32 to vector<8x256xf32>
    %102 = arith.mulf %101, %100 : vector<8x256xf32>
    %103 = arith.addf %98, %102 : vector<8x256xf32>
    %cst_54 = arith.constant 0.797884583 : f32
    %104 = vector.broadcast %cst_54 : f32 to vector<8x256xf32>
    %105 = arith.mulf %104, %103 : vector<8x256xf32>
    %106 = math.tanh %105 : vector<8x256xf32>
    %cst_55 = arith.constant 1.000000e+00 : f32
    %107 = vector.broadcast %cst_55 : f32 to vector<8x256xf32>
    %108 = arith.addf %107, %106 : vector<8x256xf32>
    %cst_56 = arith.constant 5.000000e-01 : f32
    %109 = vector.broadcast %cst_56 : f32 to vector<8x256xf32>
    %110 = arith.mulf %109, %108 : vector<8x256xf32>
    %111 = arith.mulf %98, %110 : vector<8x256xf32>
    %112 = arith.truncf %111 : vector<8x256xf32> to vector<8x256xbf16>
    %c256_57 = arith.constant 256 : index
    %c0_58 = arith.constant 0 : index
    %113 = vector.load %arg14[%c256_57, %c0_58] : memref<512x128xbf16, #tpu.memory_space<vmem>>, vector<256x128xbf16>
    %cst_59 = arith.constant dense<0.000000e+00> : vector<8x128xf32>
    %114 = tpu.matmul %112, %113, %cst_59 {dimension_numbers = #tpu.dot_dimension_numbers<[1], [0], [0], [1], [0, 0, 1, 1], [], []>} : vector<8x256xbf16>, vector<256x128xbf16>, vector<8x128xf32> -> vector<8x128xf32>
    %115 = arith.addf %93, %114 : vector<8x128xf32>
    %116 = arith.addf %45, %115 : vector<8x128xf32>
    %c0_60 = arith.constant 0 : index
    %c0_61 = arith.constant 0 : index
    %117 = vector.load %arg15[%c0_60, %c0_61] : memref<1x128xf32, #tpu.memory_space<vmem>>, vector<1x128xf32>
    %118 = vector.broadcast %117 : vector<1x128xf32> to vector<8x128xf32>
    %119 = arith.addf %116, %118 : vector<8x128xf32>
    %c0_62 = arith.constant 0 : index
    %c0_63 = arith.constant 0 : index
    %c0_64 = arith.constant 0 : index
    %120 = vector.load %arg17[%c0_62, %c0_63, %c0_64] : memref<1x8x128xf32, #tpu.memory_space<vmem>>, vector<1x8x128xf32>
    %121 = vector.shape_cast %120 : vector<1x8x128xf32> to vector<8x128xf32>
    %122 = vector.shape_cast %119 : vector<8x128xf32> to vector<1x8x128xf32>
    tpu.vector_store %arg17[%c0_62, %c0_63, %c0_64], %122 {strides = array<i32>} : memref<1x8x128xf32, #tpu.memory_space<vmem>>, vector<1x8x128xf32>,
    return
  }
  func.func @transform_0(%arg0: i32, %arg1: i32) -> (i32, i32, i32) {
    %c0_i32 = arith.constant 0 : i32
    %c0_i32_0 = arith.constant 0 : i32
    return %arg0, %arg1, %c0_i32 : i32, i32, i32
  }
  func.func @transform_1(%arg0: i32, %arg1: i32) -> (i32, i32) {
    %c0_i32 = arith.constant 0 : i32
    %c0_i32_0 = arith.constant 0 : i32
    %c0_i32_1 = arith.constant 0 : i32
    return %c0_i32, %c0_i32_0 : i32, i32
  }
  func.func @transform_2(%arg0: i32, %arg1: i32) -> (i32, i32) {
    %c0_i32 = arith.constant 0 : i32
    %c0_i32_0 = arith.constant 0 : i32
    %c0_i32_1 = arith.constant 0 : i32
    return %c0_i32, %c0_i32_0 : i32, i32
  }
  func.func @transform_3(%arg0: i32, %arg1: i32) -> (i32, i32) {
    %c0_i32 = arith.constant 0 : i32
    %c0_i32_0 = arith.constant 0 : i32
    %c0_i32_1 = arith.constant 0 : i32
    return %c0_i32, %c0_i32_0 : i32, i32
  }
  func.func @transform_4(%arg0: i32, %arg1: i32) -> (i32, i32) {
    %c0_i32 = arith.constant 0 : i32
    %c0_i32_0 = arith.constant 0 : i32
    %c0_i32_1 = arith.constant 0 : i32
    return %c0_i32, %c0_i32_0 : i32, i32
  }
  func.func @transform_5(%arg0: i32, %arg1: i32) -> (i32, i32) {
    %c0_i32 = arith.constant 0 : i32
    %c0_i32_0 = arith.constant 0 : i32
    %c0_i32_1 = arith.constant 0 : i32
    return %c0_i32, %c0_i32_0 : i32, i32
  }
  func.func @transform_6(%arg0: i32, %arg1: i32) -> (i32, i32) {
    %c0_i32 = arith.constant 0 : i32
    %c0_i32_0 = arith.constant 0 : i32
    %c0_i32_1 = arith.constant 0 : i32
    return %c0_i32, %c0_i32_0 : i32, i32
  }
  func.func @transform_7(%arg0: i32, %arg1: i32) -> (i32, i32) {
    %c0_i32 = arith.constant 0 : i32
    %c0_i32_0 = arith.constant 0 : i32
    %c0_i32_1 = arith.constant 0 : i32
    return %c0_i32, %c0_i32_0 : i32, i32
  }
  func.func @transform_8(%arg0: i32, %arg1: i32) -> (i32, i32) {
    %c0_i32 = arith.constant 0 : i32
    %c0_i32_0 = arith.constant 0 : i32
    %c0_i32_1 = arith.constant 0 : i32
    return %c0_i32, %c0_i32_0 : i32, i32
  }
  func.func @transform_9(%arg0: i32, %arg1: i32) -> (i32, i32) {
    %c0_i32 = arith.constant 0 : i32
    %c0_i32_0 = arith.constant 0 : i32
    %c0_i32_1 = arith.constant 0 : i32
    return %c0_i32, %c0_i32_0 : i32, i32
  }
  func.func @transform_10(%arg0: i32, %arg1: i32) -> (i32, i32) {
    %c0_i32 = arith.constant 0 : i32
    %c0_i32_0 = arith.constant 0 : i32
    %c0_i32_1 = arith.constant 0 : i32
    return %c0_i32, %c0_i32_0 : i32, i32
  }
  func.func @transform_11(%arg0: i32, %arg1: i32) -> (i32, i32) {
    %c0_i32 = arith.constant 0 : i32
    %c0_i32_0 = arith.constant 0 : i32
    %c0_i32_1 = arith.constant 0 : i32
    return %c0_i32, %c0_i32_0 : i32, i32
  }
  func.func @transform_12(%arg0: i32, %arg1: i32) -> (i32, i32) {
    %c0_i32 = arith.constant 0 : i32
    %c0_i32_0 = arith.constant 0 : i32
    %c0_i32_1 = arith.constant 0 : i32
    return %c0_i32, %c0_i32_0 : i32, i32
  }
  func.func @transform_13(%arg0: i32, %arg1: i32) -> (i32, i32) {
    %c0_i32 = arith.constant 0 : i32
    %c0_i32_0 = arith.constant 0 : i32
    %c0_i32_1 = arith.constant 0 : i32
    return %c0_i32, %c0_i32_0 : i32, i32
  }
  func.func @transform_14(%arg0: i32, %arg1: i32) -> (i32, i32) {
    %c0_i32 = arith.constant 0 : i32
    %c0_i32_0 = arith.constant 0 : i32
    %c0_i32_1 = arith.constant 0 : i32
    return %c0_i32, %c0_i32_0 : i32, i32
  }
  func.func @transform_15(%arg0: i32, %arg1: i32) -> (i32, i32, i32) {
    %c0_i32 = arith.constant 0 : i32
    %c0_i32_0 = arith.constant 0 : i32
    return %arg0, %arg1, %c0_i32 : i32, i32, i32
  }
}

</mosaic_0001>

<bundles_post_ra>
// kernel: tpu_custom_call.1
= control target key start
LH: loop header
LB: loop body
LE: loop exit
PB: predicated region body
PF: predicated region fallthrough
CT: control target
= control target key end

     0   :  { %s3465_s0 = inlined_call_operand.hbm [shape: f32[2,16,128], index: 0, kind: input, shape index: {}]   ;;  %s3466_s1 = inlined_call_operand.hbm [shape: bf16[128,128], index: 1, kind: input, shape index: {}]   ;;  %s3467_s2 = inlined_call_operand.hbm [shape: bf16[128,128], index: 2, kind: input, shape index: {}]   ;;  %s3468_s3 = inlined_call_operand.hbm [shape: bf16[128,128], index: 3, kind: input, shape index: {}]   ;;  %s3469_s4 = inlined_call_operand.hbm [shape: bf16[128,128], index: 4, kind: input, shape index: {}]   ;;  %s3470_s5 = inlined_call_operand.vmem [shape: f32[1,128], index: 5, kind: input, shape index: {}]   ;;  %s3471_s6 = inlined_call_operand.vmem [shape: f32[1,128], index: 6, kind: input, shape index: {}]   ;;  %s3472_s7 = inlined_call_operand.vmem [shape: f32[1,128], index: 7, kind: input, shape index: {}]   ;;  %s3473_s8 = inlined_call_operand.vmem [shape: f32[1,128], index: 8, kind: input, shape index: {}]   ;;  %s3474_s9 = inlined_call_operand.vmem [shape: f32[1,128], index: 9, kind: input, shape index: {}]   ;;  %s3475_s10 = inlined_call_operand.hbm [shape: bf16[128,512], index: 10, kind: input, shape index: {}]   ;;  %s3476_s11 = inlined_call_operand.vmem [shape: f32[1,512], index: 11, kind: input, shape index: {}]   ;;  %s3477_s12 = inlined_call_operand.hbm [shape: bf16[512,128], index: 12, kind: input, shape index: {}]   ;;  %s3478_s13 = inlined_call_operand.vmem [shape: f32[1,128], index: 13, kind: input, shape index: {}]   ;;  %s3479_s14 = inlined_call_operand.hbm [shape: bf16[128,128], index: 14, kind: input, shape index: {}]   ;;  %s3480_s15 = inlined_call_operand.hbm [shape: f32[2,16,128], index: 15, kind: output, shape index: {}]  }
   0x1   :  { %3492 = sst [smem:[#allocation28_spill]] %s3466_s1 }
   0x2   :  { %3493 = sst [smem:[#allocation29_spill]] %s3467_s2 }
   0x3   :  { %3494 = sst [smem:[#allocation30_spill]] %s3468_s3 }
   0x4   :  { %3495 = sst [smem:[#allocation31_spill]] %s3469_s4 }
   0x5   :  { %3496 = sst [smem:[#allocation32_spill]] %s3473_s8 }
   0x6   :  { %3497 = sst [smem:[#allocation33_spill]] %s3474_s9 }
   0x7   :  { %3498 = sst [smem:[#allocation34_spill]] %s3475_s10 }
   0x8   :  { %3499 = sst [smem:[#allocation35_spill]] %s3476_s11 }
   0x9   :  { %3500 = sst [smem:[#allocation36_spill]] %s3477_s12 }
   0xa   :  { %3501 = sst [smem:[#allocation37_spill]] %s3478_s13 }
   0xb   :  { %3502 = sst [smem:[#allocation38_spill]] %s3479_s14 }
   0xc   :  { %3503 = sst [smem:[#allocation39_spill]] %s3480_s15 }
   0xd   :  { %20 = vsyncpa [#allocation3], 0 }
   0xe   :  { %22 = vsyncpa [#allocation3 + $0x1], 0 }
   0xf   :  { %23 = vsyncpa [#allocation6], 0 }
  0x10   :  { %24 = vsyncpa [#allocation9], 0 }
  0x11   :  { %25 = vsyncpa [#allocation12], 0 }
  0x12   :  { %26 = vsyncpa [#allocation15], 0 }
  0x13   :  { %27 = vsyncpa [#allocation4], 0 }
  0x14   :  { %29 = vsyncpa [#allocation4 + $0x1], 0  ;;  %s3112_s18 = smov 0   ;;  %s3114_s19 = smov 0  }
  0x15   :  { %s3116_s20 = smov 0   ;;  %s3118_s21 = smov 0  }
  0x16   :  { %s3120_s22 = smov 0   ;;  %s3122_s23 = smov 0  }
  0x17   :  { %s3124_s24 = smov 0   ;;  %s3126_s25 = smov 0  }
  0x18 LB: > { %3504 = sst [smem:[#allocation23_spill]] %s2998_s21  ;;  %s3481_s26 = sadd.s32 4294967295, %s3014_s25   ;;  %s3014_s25 = sphi %s3126_s25, %s35_s25   ;;  %s3010_s24 = sphi %s3124_s24, %s3546_s24   ;;  %s3006_s23 = sphi %s3122_s23, %s3545_s23   ;;  %s3002_s22 = sphi %s3120_s22, %s3544_s22   ;;  %s2998_s21 = sphi %s3118_s21, %s3543_s21   ;;  %s2994_s20 = sphi %s3116_s20, %s3542_s20   ;;  %s2990_s19 = sphi %s3114_s19, %s3541_s19   ;;  %s2986_s18 = sphi %s3112_s18, %s3540_s18  }
  0x19   : > { %3505 = sst [smem:[#allocation24_spill]] %s3002_s22  ;;  %p2076_p0 = scmp.ge.s32.totalorder %s3014_s25, 1 }
  0x1a   : > { %p3156_p1 = scmp.eq.s32.totalorder %s3481_s26, 0  ;;  %p402_p2 = scmp.lt.s32.totalorder %s3014_s25, 5 }
  0x1b   : > { %s3016_s29 = smov [#allocation5]   ;;  %s3017_s17 = smov [#allocation8]  }
  0x1c   : > { %p3161_p3 = pnand %p2076_p0, %p402_p2  ;;  %s414_s30 = sshll.u32 %s3016_s29, 4  ;;  %s415_s30 = int_to_ptr.vmem [resolvable:$true] %s414_s30 }
  0x1d   : > { %s440_s26 = sshll.u32 %s3017_s17, 4  ;;  %s3018_s15 = smov [#allocation11]   ;;  %s441_s26 = int_to_ptr.vmem [resolvable:$true] %s440_s26 }
  0x1e   : > { %p2434_p4 = pneg %p3161_p3  ;;  %s481_s13 = sshll.u32 %s3018_s15, 4  ;;  %s482_s13 = int_to_ptr.vmem [resolvable:$true] %s481_s13 }
  0x1f   : > { %s2703_s29 = scalar_lea.vmem %s415_s30, 1024  ;;  %p2711_p10 = scmp.lt.s32.totalorder %s415_s30, %s415_s30 }
  0x20   : > { %p3169_p5 = pnand %p2434_p4, %p3156_p1  ;;  %p2704_p7 = scmp.ne.s32.totalorder %s415_s30, %s2703_s29 }
  0x21   : > { %p2712_p11 = scmp.lt.s32.totalorder %s2703_s29, %s2703_s29 }
  0x22   : > { %p3175_p6 = pneg %p3169_p5 }
  0x23   : > { %p2713_p12 = por %p2712_p11, %p2711_p10 }
  0x24   : > { %p2706_p8 = pnand %p2704_p7, %p3175_p6 }
  0x26   : > { %p2707_p9 = pneg %p2706_p8 }
  0x28   : > { %p2714_p13 = pnand %p2713_p12, %p2707_p9 }
  0x2a   : > { %2717 = shalt.err (!%p2714_p13)
}
  0x2b   : > { %s3484_s17 = smov 64   ;;  %s3486_s15 = smov 4  }
  0x2c   : > { %s3510_s1 = sld [smem:[#allocation28_spill]]  ;;  %s2729_s9 = scalar_lea.vmem %s441_s26, 1024 }
  0x2d   : > { %p2730_p0 = scmp.ne.s32.totalorder %s441_s26, %s2729_s9  ;;  %p2737_p7 = scmp.lt.s32.totalorder %s441_s26, %s441_s26 }
  0x2e   : > { %p2738_p8 = scmp.lt.s32.totalorder %s2729_s9, %s2729_s9 }
  0x2f   : > { %p2732_p2 = pnand %p2730_p0, %p3175_p6 }
  0x30   : > { %p2739_p9 = por %p2738_p8, %p2737_p7 }
  0x31   : > { %p2733_p4 = pneg %p2732_p2 }
  0x32   : > { %2437 = dma.hbm_to_vmem [thread:$0]  (!%p3169_p5), %s3510_s1, 1024, %s415_s30, [#allocation6], %s3484_s17, %s3484_s17, %s3486_s15  }
  0x33   : > { %p2740_p10 = pnand %p2739_p9, %p2733_p4 }
  0x35   : > { %2743 = shalt.err (!%p2740_p10)
}
  0x36   : > { %s3511_s3 = sld [smem:[#allocation30_spill]]  ;;  %s2755_s11 = scalar_lea.vmem %s482_s13, 4096 }
  0x37   : > { %p2756_p11 = scmp.ne.s32.totalorder %s482_s13, %s2755_s11  ;;  %p2763_p0 = scmp.lt.s32.totalorder %s482_s13, %s482_s13 }
  0x38   : > { %p2764_p2 = scmp.lt.s32.totalorder %s2755_s11, %s2755_s11 }
  0x39   : > { %p2758_p12 = pnand %p2756_p11, %p3175_p6 }
  0x3a   : > { %p2765_p4 = por %p2764_p2, %p2763_p0 }
  0x3b   : > { %p2759_p13 = pneg %p2758_p12 }
  0x3c   : > { %2443 = dma.hbm_to_vmem [thread:$0]  (!%p3169_p5), %s3511_s3, 1024, %s441_s26, [#allocation9], %s3484_s17, %s3484_s17, %s3486_s15  }
  0x3d   : > { %p2766_p7 = pnand %p2765_p4, %p2759_p13 }
  0x3f   : > { %2769 = shalt.err (!%p2766_p7)
}
  0x40   : > { %s3021_s9 = smov 256   ;;  %s3022_s22 = smov 16  }
  0x41   : > { %s3512_s10 = sld [smem:[#allocation34_spill]]  ;;  %s3023_s26 = smov [#allocation7]  }
  0x42   : > { %s427_s29 = sshll.u32 %s3023_s26, 4  ;;  %s3024_s17 = smov [#allocation10]   ;;  %s428_s29 = int_to_ptr.vmem [resolvable:$true] %s427_s29 }
  0x43   : > { %s453_s15 = sshll.u32 %s3024_s17, 4  ;;  %s2781_s1 = scalar_lea.vmem %s428_s29, 1024  ;;  %s454_s15 = int_to_ptr.vmem [resolvable:$true] %s453_s15 }
  0x44   : > { %p2782_p8 = scmp.ne.s32.totalorder %s428_s29, %s2781_s1  ;;  %p2789_p11 = scmp.lt.s32.totalorder %s428_s29, %s428_s29 }
  0x45   : > { %p2790_p12 = scmp.lt.s32.totalorder %s2781_s1, %s2781_s1 }
  0x46   : > { %p2784_p9 = pnand %p2782_p8, %p3175_p6 }
  0x47   : > { %2449 = dma.hbm_to_vmem [thread:$0]  (!%p3169_p5), %s3512_s10, 4096, %s482_s13, [#allocation12], %s3021_s9, %s3021_s9, %s3022_s22  }
  0x48   : > { %p2785_p10 = pneg %p2784_p9  ;;  %p2791_p13 = por %p2790_p12, %p2789_p11 }
  0x4a   : > { %p2792_p0 = pnand %p2791_p13, %p2785_p10 }
  0x4c   : > { %2795 = shalt.err (!%p2792_p0)
}
  0x4d   : > { %s3513_s11 = smov 4   ;;  %s3514_s30 = smov 64  }
  0x4e   : > { %s3515_s2 = sld [smem:[#allocation29_spill]]  ;;  %s2807_s17 = scalar_lea.vmem %s454_s15, 1024 }
  0x4f   : > { %p2808_p2 = scmp.ne.s32.totalorder %s454_s15, %s2807_s17  ;;  %p2815_p8 = scmp.lt.s32.totalorder %s454_s15, %s454_s15 }
  0x50   : > { %p2816_p9 = scmp.lt.s32.totalorder %s2807_s17, %s2807_s17 }
  0x51   : > { %p2810_p4 = pnand %p2808_p2, %p3175_p6 }
  0x52   : > { %p2817_p10 = por %p2816_p9, %p2815_p8 }
  0x53   : > { %p2811_p7 = pneg %p2810_p4 }
  0x54   : > { %2440 = dma.hbm_to_vmem [thread:$0]  (!%p3169_p5), %s3515_s2, 1024, %s428_s29, [#allocation6], %s3514_s30, %s3514_s30, %s3513_s11  }
  0x55   : > { %p2818_p11 = pnand %p2817_p10, %p2811_p7 }
  0x57   : > { %2821 = shalt.err (!%p2818_p11)
}
  0x58   : > { %s3516_s4 = sld [smem:[#allocation31_spill]]  ;;  %s3025_s8 = smov [#allocation13]  }
  0x59   : > { %s497_s26 = sshll.u32 %s3025_s8, 4  ;;  %s3026_s29 = smov [#allocation14]   ;;  %s498_s26 = int_to_ptr.vmem [resolvable:$true] %s497_s26 }
  0x5a   : > { %s513_s13 = sshll.u32 %s3026_s29, 4  ;;  %s2833_s9 = scalar_lea.vmem %s498_s26, 4096  ;;  %s514_s13 = int_to_ptr.vmem [resolvable:$true] %s513_s13 }
  0x5b   : > { %p2834_p12 = scmp.ne.s32.totalorder %s498_s26, %s2833_s9  ;;  %p2841_p2 = scmp.lt.s32.totalorder %s498_s26, %s498_s26 }
  0x5c   : > { %p2842_p4 = scmp.lt.s32.totalorder %s2833_s9, %s2833_s9 }
  0x5d   : > { %p2836_p13 = pnand %p2834_p12, %p3175_p6 }
  0x5e   : > { %2446 = dma.hbm_to_vmem [thread:$0]  (!%p3169_p5), %s3516_s4, 1024, %s454_s15, [#allocation9], %s3514_s30, %s3514_s30, %s3513_s11  }
  0x5f   : > { %p2837_p0 = pneg %p2836_p13  ;;  %p2843_p7 = por %p2842_p4, %p2841_p2 }
  0x61   : > { %p2844_p8 = pnand %p2843_p7, %p2837_p0 }
  0x63   : > { %2847 = shalt.err (!%p2844_p8)
}
  0x64   : > { %s3517_s12 = sld [smem:[#allocation36_spill]]  ;;  %s2859_s1 = scalar_lea.vmem %s514_s13, 1024 }
  0x65   : > { %p2860_p9 = scmp.ne.s32.totalorder %s514_s13, %s2859_s1  ;;  %p2867_p12 = scmp.lt.s32.totalorder %s514_s13, %s514_s13 }
  0x66   : > { %p2868_p13 = scmp.lt.s32.totalorder %s2859_s1, %s2859_s1 }
  0x67   : > { %p2862_p10 = pnand %p2860_p9, %p3175_p6 }
  0x68   : > { %p2869_p0 = por %p2868_p13, %p2867_p12 }
  0x69   : > { %p2863_p11 = pneg %p2862_p10 }
  0x6a   : > { %2452 = dma.hbm_to_vmem [thread:$0]  (!%p3169_p5), %s3517_s12, 4096, %s498_s26, [#allocation12], %s3514_s30, %s3514_s30, %s3513_s11  }
  0x6b   : > { %p2870_p2 = pnand %p2869_p0, %p2863_p11 }
  0x6d   : > { %2873 = shalt.err (!%p2870_p2)
}
  0x6e   : > { %s3518_s14 = sld [smem:[#allocation38_spill]]  ;;  %s2075_s21 = sadd.s32 4294967294, %s3014_s25  }
  0x6f   : > { %s44_s16 = sadd.s32 1, %s3006_s23  ;;  %s47_s26 = sadd.s32 1, %s3010_s24 }
  0x70   : > { %p45_p6 = scmp.ge.s32.totalorder %s44_s16, 2  ;;  %s56_s29 = sadd.s32 1, %s2994_s20 }
  0x71   : > { %p63_p4 = scmp.ne.s32.totalorder %s2994_s20, %s2990_s19  ;;  %p64_p7 = scmp.eq.s32.totalorder %s3014_s25, 0 }
  0x72   : > { %s3548_s16 = smov (%p45_p6, %s44_s16), 0  ;;  %s3550_s26 = smov (!%p45_p6, %s47_s26), %s3010_s24 }
  0x73   : > { %3519 = sst [smem:[#allocation25_spill]] %s3548_s16  ;;  %s52_s9 = ssub.s32 %s3006_s23, %s3548_s16 }
  0x74   : > { %2455 = dma.hbm_to_vmem [thread:$0]  (!%p3169_p5), %s3518_s14, 1024, %s514_s13, [#allocation15], %s3514_s30, %s3514_s30, %s3513_s11  }
  0x75   : > { %p3258_p8 = por %p64_p7, %p63_p4  ;;  %p49_p5 = scmp.ge.s32.totalorder %s3550_s26, 2 }
  0x76   : > { %p69_p9 = scmp.ne.s32.totalorder %s2990_s19, %s2986_s18  ;;  %s3521_s11 = sadd.s32 4294967295, %s3014_s25  }
  0x77   : > { %p389_p10 = scmp.eq.s32.totalorder %s3521_s11, 3  ;;  %p395_p11 = scmp.eq.s32.totalorder %s2075_s21, 3 }
  0x78   : > { %s3552_s26 = smov (%p49_p5, %s3550_s26), 0  ;;  %p3270_p12 = por %p3156_p1, %p69_p9 }
  0x79   : > { %3522 = sst [smem:[#allocation26_spill]] %s3552_s26  ;;  %p3274_p13 = por %p389_p10, %p63_p4 }
  0x7a   : > { %s51_s17 = ssub.s32 %s3010_s24, %s3552_s26  ;;  %p3280_p0 = por %p395_p11, %p69_p9 }
  0x7b   : > { %s3524_s13 = scalar_select %p3274_p13, 1, 0 }
  0x7c   : > { %s3525_s1 = scalar_select %p3280_p0, 1, 0 }
  0x7d   : > { %s53_s22 = sor.u32 %s52_s9, %s51_s17  ;;  %p2471_p2 = scmp.lt.s32.totalorder %s3014_s25, 4 }
  0x7e   : > { %3526 = sst [smem:[#allocation27_spill]] %s3525_s1  ;;  %p54_p6 = scmp.eq.s32.totalorder %s53_s22, 0 }
  0x7f   : > { %s527_s8 = sand.u32 1, %s2994_s20   ;;  %s2086_s2 = sshll.u32 %s3010_s24, 1 }
  0x80   : > { %s2085_s21 = sshll.u32 %s527_s8, 3  ;;  %s536_s3 = sadd.s32 %s3006_s23, %s2086_s2 }
  0x81   : > { %s3287_s11 = scalar_select %p54_p6, %s2994_s20, %s56_s29  }
  0x82   : > { %s531_s4 = scalar_lea.vmem [#allocation2], %s2085_s21  ;;  %s2087_s12 = sshll.u32 %s536_s3, 7 }
  0x83   : > { %s540_s10 = sshll.u32 %s531_s4, 4  ;;  %s538_s26 = scalar_lea.hbm %s3465_s0, %s2087_s12  ;;  %s541_s10 = int_to_ptr.vmem [resolvable:$true] %s540_s10 }
  0x84   : > { %p3296_p4 = pnand %p2471_p2, %p3258_p8  ;;  %s528_s9 = scalar_lea.sflag [#allocation3], %s527_s8 }
  0x85   : > { %s2887_s29 = scalar_lea.vmem %s541_s10, 128  ;;  %s3027_s2 = smov [#allocation2]  }
  0x86   : > { %p2876_p7 = pneg %p3296_p4  ;;  %p2888_p5 = scmp.ne.s32.totalorder %s541_s10, %s2887_s29 }
  0x87   : > { %s2892_s3 = sshll.u32 %s3027_s2, 4  ;;  %s2893_s3 = int_to_ptr.vmem [resolvable:$false] %s2892_s3 }
  0x88   : > { %p2890_p9 = pnand %p2888_p5, %p2876_p7  ;;  %s2894_s4 = scalar_lea.vmem %s2893_s3, 256 }
  0x89   : > { %p2895_p11 = scmp.lt.s32.totalorder %s541_s10, %s2893_s3  ;;  %p2896_p6 = scmp.lt.s32.totalorder %s2894_s4, %s2887_s29 }
  0x8a   : > { %p2891_p10 = pneg %p2890_p9 }
  0x8b   : > { %p2897_p0 = por %p2896_p6, %p2895_p11 }
  0x8d   : > { %p2898_p13 = pnand %p2897_p0, %p2891_p10 }
  0x8f   : > { %2901 = shalt.err (!%p2898_p13)
}
  0x90   : > { %2459 = dma.hbm_to_vmem [thread:$0]  (!%p3296_p4), %s538_s26, 128, %s541_s10, %s528_s9  }
  0x91   : > { %549 = sbr.rel (%p3161_p3) target bundleno = 1828 (0x724), region = 80  ;;  %s3307_s12 = sand.u32 (!%p3161_p3), 1, %s2990_s19  }
  0x92   : > { %s2089_s14 = sshll.u32 (!%p3161_p3), %s3307_s12, 3  ;;  %s552_s16 = scalar_lea.sflag (!%p3161_p3), [#allocation3], %s3307_s12 }
  0x93   : > { %s555_s15 = scalar_lea.vmem (!%p3161_p3), [#allocation2], %s2089_s14 }
  0x96   : > { %2961 = dma.done.wait (%p3270_p12), %s552_s16, 128  }
  0x97   : > { %2963 = vsyncadd (%p3270_p12), %s552_s16, 4294967168 }
  0x98   : > { %2965 = dma.done.wait (%p3156_p1), [#allocation6], 2048  }
  0x99   : > { %2967 = vsyncadd (%p3156_p1), [#allocation6], 4294965248 }
  0x9a   : > { %2969 = dma.done.wait (%p3156_p1), [#allocation9], 2048  }
  0x9b   : > { %2971 = vsyncadd (%p3156_p1), [#allocation9], 4294965248 }
  0x9c   : > { %2973 = dma.done.wait (%p3156_p1), [#allocation12], 8192  }
  0x9d   : > { %2975 = vsyncadd (%p3156_p1), [#allocation12], 4294959104 }
  0x9e   : > { %2977 = dma.done.wait (%p3156_p1), [#allocation15], 1024  }
  0x9f   : > { %2979 = vsyncadd (%p3156_p1), [#allocation15], 4294966272  ;;  %v3333_v0 = vld [vmem:[%s555_s15] sm:$0xff]  ;;  %v3028_v4 = vmov 0.0   ;;  %v2562_v10 = vld [vmem:[#allocation5 + $0x28] sm:$0xff]   ;;  %vm3029_vm0 = vmmov 0  }
  0xa0   : > { %634 = vadd.xlane.f32.xlu0 %v3333_v0  ;;  %v2558_v1 = vld [vmem:[#allocation5 + $0x38] sm:$0xff]   ;;  %v2560_v3 = vld [vmem:[#allocation5 + $0x30] sm:$0xff]   ;;  %2302 = vmatprep.subr.bf16.mxu0 %v3028_v4  ;;  %v2563_v11 = vld [vmem:[#allocation7 + $0x28] sm:$0xff]   ;;  %s3528_s8 = sld [smem:[#allocation32_spill]]  ;;  %s1907_s16 = scalar_lea.sflag [#allocation4], %s3307_s12 }
  0xa1   : > { %v2559_v2 = vld [vmem:[#allocation7 + $0x38] sm:$0xff]   ;;  %2322 = vmatprep.subr.bf16.mxu1 %v3028_v4  ;;  %v2561_v5 = vld [vmem:[#allocation7 + $0x30] sm:$0xff]   ;;  %2303 = vmatpush3.bf16.msra.mxu0 %v2558_v1  ;;  %v2564_v12 = vld [vmem:[#allocation5 + $0x20] sm:$0xff]   ;;  %s3529_s29 = sld [smem:[#allocation33_spill]]  ;;  %p3535_p3 = scmp.ne.s32.totalorder %s3524_s13, 0 }
  0xa2   : > { %2323 = vmatpush3.bf16.msra.mxu1 %v2559_v2  ;;  %2304 = vmatprep.subr.bf16.mxu0 %v3028_v4  ;;  %v2565_v13 = vld [vmem:[#allocation7 + $0x20] sm:$0xff]   ;;  %v2566_v14 = vld [vmem:[#allocation5 + $0x18] sm:$0xff]   ;;  %v2568_v16 = vld [vmem:[#allocation5 + $0x10] sm:$0xff]   ;;  %s3530_s4 = sld [smem:[#allocation35_spill]] }
  0xa3   : > { %2324 = vmatprep.subr.bf16.mxu1 %v3028_v4  ;;  %2318 = vmatprep.mubr.msk.bf16.mxu0 %vm3029_vm0, %v3028_v4  ;;  %v2567_v15 = vld [vmem:[#allocation7 + $0x18] sm:$0xff]   ;;  %v2569_v17 = vld [vmem:[#allocation7 + $0x10] sm:$0xff]   ;;  %v2570_v18 = vld [vmem:[#allocation5 + $0x8] sm:$0xff]   ;;  %s3531_s10 = sld [smem:[#allocation24_spill]] }
  0xa4   : > { %2338 = vmatprep.mubr.msk.bf16.mxu1 %vm3029_vm0, %v3028_v4  ;;  %v2571_v19 = vld [vmem:[#allocation7 + $0x8] sm:$0xff]   ;;  %v2572_v20 = vld [vmem:[#allocation5] sm:$0xff]   ;;  %v2098_v26 = vld [vmem:[%s3471_s6] ss:$0 sm:$0xff]  ;;  %s3532_s27 = sld [smem:[#allocation23_spill]] }
  0xa5   : > { %2305 = vmatpush3.bf16.msra.mxu0 %v2560_v3  ;;  %v2573_v21 = vld [vmem:[#allocation7] sm:$0xff]   ;;  %v2099_v28 = vld [vmem:[%s3472_s7] ss:$0 sm:$0xff]  ;;  %v2574_v31 = vld [vmem:[#allocation8 + $0x38] sm:$0xff]   ;;  %s3533_s1 = sld [smem:[#allocation37_spill]] }
  0xa6   : > { %2325 = vmatpush3.bf16.msra.mxu1 %v2561_v5  ;;  %2306 = vmatprep.subr.bf16.mxu0 %v3028_v4  ;;  %v2582_v33 = vld [vmem:[#allocation14 + $0x38] sm:$0xff]   ;;  %v2575_v34 = vld [vmem:[#allocation8 + $0x30] sm:$0xff]   ;;  %v2576_v36 = vld [vmem:[#allocation8 + $0x28] sm:$0xff]   ;;  %s3534_s2 = sld [smem:[#allocation39_spill]] }
  0xa7   : > { %2326 = vmatprep.subr.bf16.mxu1 %v3028_v4  ;;  %v2583_v35 = vld [vmem:[#allocation14 + $0x30] sm:$0xff]   ;;  %v2584_v37 = vld [vmem:[#allocation14 + $0x28] sm:$0xff]   ;;  %v2577_v38 = vld [vmem:[#allocation8 + $0x20] sm:$0xff]  }
  0xa8   : > { %v2578_v39 = vld [vmem:[#allocation8 + $0x18] sm:$0xff]   ;;  %v2579_v40 = vld [vmem:[#allocation8 + $0x10] sm:$0xff]   ;;  %v2580_v41 = vld [vmem:[#allocation8 + $0x8] sm:$0xff]  }
  0xa9   : > { %2307 = vmatpush3.bf16.msra.mxu0 %v2562_v10  ;;  %v2581_v42 = vld [vmem:[#allocation8] sm:$0xff]   ;;  %v2586_v44 = vld [vmem:[#allocation14 + $0x18] sm:$0xff]   ;;  %v2587_v45 = vld [vmem:[#allocation14 + $0x10] sm:$0xff]   ;;  %s2209_s28 = sshll.u32 %s3531_s10, 1  ;;  %s3031_s10 = smov [#allocation16]  }
  0xaa   : > { %2327 = vmatpush3.bf16.msra.mxu1 %v2563_v11  ;;  %2308 = vmatprep.subr.bf16.mxu0 %v3028_v4  ;;  %v2585_v43 = vld [vmem:[#allocation14 + $0x20] sm:$0xff]   ;;  %v2588_v46 = vld [vmem:[#allocation14 + $0x8] sm:$0xff]   ;;  %v2590_v48 = vld [vmem:[#allocation10 + $0x38] sm:$0xff]   ;;  %s1918_s26 = sadd.s32 %s3532_s27, %s2209_s28  ;;  %s2906_s27 = sshll.u32 %s3031_s10, 4  ;;  %s2907_s27 = int_to_ptr.vmem [resolvable:$false] %s2906_s27 }
  0xab   : > { %2328 = vmatprep.subr.bf16.mxu1 %v3028_v4  ;;  %v2589_v47 = vld [vmem:[#allocation14] sm:$0xff]   ;;  %v2591_v49 = vld [vmem:[#allocation10 + $0x30] sm:$0xff]   ;;  %v2592_v50 = vld [vmem:[#allocation10 + $0x28] sm:$0xff]   ;;  %s2210_s22 = sshll.u32 %s1918_s26, 7 }
  0xac   : > { %v2593_v51 = vld [vmem:[#allocation10 + $0x20] sm:$0xff]   ;;  %v2594_v52 = vld [vmem:[#allocation10 + $0x18] sm:$0xff]   ;;  %v2595_v53 = vld [vmem:[#allocation10 + $0x10] sm:$0xff]   ;;  %s1920_s3 = scalar_lea.hbm %s3534_s2, %s2210_s22 }
  0xad   : > { %2309 = vmatpush3.bf16.msra.mxu0 %v2564_v12  ;;  %v2596_v54 = vld [vmem:[#allocation10 + $0x8] sm:$0xff]  }
  0xae   : > { %2329 = vmatpush3.bf16.msra.mxu1 %v2565_v13  ;;  %2310 = vmatprep.subr.bf16.mxu0 %v3028_v4 }
  0xaf   : > { %2330 = vmatprep.subr.bf16.mxu1 %v3028_v4 }
  0xb1   : > { %2311 = vmatpush3.bf16.msra.mxu0 %v2566_v14  ;;  %v2132_v14 = vld [vmem:[%s3470_s5] ss:$0 sm:$0xff] }
  0xb2   : > { %2331 = vmatpush3.bf16.msra.mxu1 %v2567_v15  ;;  %2312 = vmatprep.subr.bf16.mxu0 %v3028_v4 }
  0xb3   : > { %2332 = vmatprep.subr.bf16.mxu1 %v3028_v4 }
  0xb5   : > { %2313 = vmatpush3.bf16.msra.mxu0 %v2568_v16 }
  0xb6   : > { %2333 = vmatpush3.bf16.msra.mxu1 %v2569_v17  ;;  %2314 = vmatprep.subr.bf16.mxu0 %v3028_v4 }
  0xb7   : > { %2334 = vmatprep.subr.bf16.mxu1 %v3028_v4 }
  0xb9   : > { %2315 = vmatpush3.bf16.msra.mxu0 %v2570_v18 }
  0xba   : > { %2335 = vmatpush3.bf16.msra.mxu1 %v2571_v19  ;;  %2316 = vmatprep.subr.bf16.mxu0 %v3028_v4 }
  0xbb   : > { %2336 = vmatprep.subr.bf16.mxu1 %v3028_v4 }
  0xbd   : > { %2317 = vmatpush3.bf16.msra.mxu0 %v2572_v20 }
  0xbe   : > { %2337 = vmatpush3.bf16.msra.mxu1 %v2573_v21  ;;  %2342 = vmatprep.subr.bf16.mxu0 %v3028_v4  ;;  %v2598_v21 = vld [vmem:[#allocation11 + $0xe0] ss:$16 sps:$4 sm:$0xff]  }
  0xbf   : > { %2362 = vmatprep.subr.bf16.mxu1 %v3028_v4 }
 0x129   : > { %v635_v6 = vpop.xlane.xlu0 %634 }
 0x12a   : > { %v637_v7 = vmul.f32 0.0078125, %v635_v6 }
 0x12c   : > { %v638_v8 = vsub.f32 %v3333_v0, %v637_v7 }
 0x12e   : > { %v639_v9 = vmul.f32 %v638_v8, %v638_v8 }
 0x130   : > { %640 = vadd.xlane.f32.xlu0 %v639_v9 }
 0x1b9   : > { %v641_v22 = vpop.xlane.xlu0 %640 }
 0x1ba   : > { %v642_v23 = vmul.f32 0.0078125, %v641_v22  ;;  %v2600_v22 = vld [vmem:[#allocation11 + $0xe4] ss:$16 sps:$4 sm:$0xff]  }
 0x1bc   : > { %v643_v24 = vadd.f32 1e-05, %v642_v23  ;;  %v2601_v23 = vld [vmem:[#allocation11 + $0xe8] ss:$16 sps:$4 sm:$0xff]  }
 0x1be   : > { %2678 = vrsqrt.f32 %v643_v24  ;;  %v2603_v24 = vld [vmem:[#allocation11 + $0xec] ss:$16 sps:$4 sm:$0xff]  }
 0x1cb   : > { %v2679_v25 = vpop.eup %2678 }
 0x1cc   : > { %v645_v27 = vmul.f32 %v2679_v25, %v638_v8  ;;  %v2597_v8 = vld [vmem:[#allocation10] sm:$0xff]  }
 0x1cd   : > { %v2606_v25 = vld [vmem:[#allocation11 + $0xc4] ss:$16 sps:$4 sm:$0xff]  }
 0x1ce   : > { %v652_v29 = vmul.f32 %v2098_v26, %v645_v27  ;;  %v2609_v26 = vld [vmem:[#allocation11 + $0xcc] ss:$16 sps:$4 sm:$0xff]   ;;  %v2604_v27 = vld [vmem:[#allocation11 + $0xc0] ss:$16 sps:$4 sm:$0xff]  }
 0x1d0   : > { %v659_v30 = vadd.f32 %v2099_v28, %v652_v29  ;;  %v2607_v28 = vld [vmem:[#allocation11 + $0xc8] ss:$16 sps:$4 sm:$0xff]  }
 0x1d2   : > { %v660_v32 = vpack.c.bf16 %v659_v30, %v659_v30 }
 0x1d4   : > { %2319 = vmatmul.mubr.bf16.vlgmr.msra.gmra.mxu0 %v660_v32  ;;  %2339 = vmatmul.mubr.bf16.vlgmr.msra.gmra.mxu1 %v660_v32 }
 0x1d5   : > { %2343 = vmatpush3.bf16.msra.mxu0 %v2574_v31  ;;  %2358 = vmatprep.mubr.msk.bf16.mxu0 %vm3029_vm0, %v3028_v4 }
 0x1d6   : > { %2344 = vmatprep.subr.bf16.mxu0 %v3028_v4  ;;  %2363 = vmatpush3.bf16.msra.mxu1 %v2582_v33  ;;  %v2615_v33 = vld [vmem:[#allocation11 + $0xac] ss:$16 sps:$4 sm:$0xff]  }
 0x1d7   : > { %2364 = vmatprep.subr.bf16.mxu1 %v3028_v4  ;;  %2378 = vmatprep.mubr.msk.bf16.mxu1 %vm3029_vm0, %v3028_v4 }
 0x1d9   : > { %2345 = vmatpush3.bf16.msra.mxu0 %v2575_v34  ;;  %v2610_v34 = vld [vmem:[#allocation11 + $0xa0] ss:$16 sps:$4 sm:$0xff]  }
 0x1da   : > { %2346 = vmatprep.subr.bf16.mxu0 %v3028_v4  ;;  %2365 = vmatpush3.bf16.msra.mxu1 %v2583_v35  ;;  %v2613_v35 = vld [vmem:[#allocation11 + $0xa8] ss:$16 sps:$4 sm:$0xff]  }
 0x1db   : > { %2366 = vmatprep.subr.bf16.mxu1 %v3028_v4 }
 0x1dd   : > { %2347 = vmatpush3.bf16.msra.mxu0 %v2576_v36  ;;  %v2616_v36 = vld [vmem:[#allocation11 + $0x80] ss:$16 sps:$4 sm:$0xff]  }
 0x1de   : > { %2348 = vmatprep.subr.bf16.mxu0 %v3028_v4  ;;  %2367 = vmatpush3.bf16.msra.mxu1 %v2584_v37  ;;  %v2618_v37 = vld [vmem:[#allocation11 + $0x84] ss:$16 sps:$4 sm:$0xff]  }
 0x1df   : > { %2368 = vmatprep.subr.bf16.mxu1 %v3028_v4 }
 0x1e1   : > { %2349 = vmatpush3.bf16.msra.mxu0 %v2577_v38  ;;  %v2619_v38 = vld [vmem:[#allocation11 + $0x88] ss:$16 sps:$4 sm:$0xff]  }
 0x1e2   : > { %2350 = vmatprep.subr.bf16.mxu0 %v3028_v4  ;;  %2369 = vmatpush3.bf16.msra.mxu1 %v2585_v43  ;;  %v2625_v43 = vld [vmem:[#allocation11 + $0x68] ss:$16 sps:$4 sm:$0xff]  }
 0x1e3   : > { %2370 = vmatprep.subr.bf16.mxu1 %v3028_v4 }
 0x1e5   : > { %2351 = vmatpush3.bf16.msra.mxu0 %v2578_v39  ;;  %v2621_v39 = vld [vmem:[#allocation11 + $0x8c] ss:$16 sps:$4 sm:$0xff]  }
 0x1e6   : > { %2352 = vmatprep.subr.bf16.mxu0 %v3028_v4  ;;  %2371 = vmatpush3.bf16.msra.mxu1 %v2586_v44  ;;  %v2630_v44 = vld [vmem:[#allocation11 + $0x44] ss:$16 sps:$4 sm:$0xff]  }
 0x1e7   : > { %2372 = vmatprep.subr.bf16.mxu1 %v3028_v4 }
 0x1e9   : > { %2353 = vmatpush3.bf16.msra.mxu0 %v2579_v40  ;;  %v2624_v40 = vld [vmem:[#allocation11 + $0x64] ss:$16 sps:$4 sm:$0xff]  }
 0x1ea   : > { %2354 = vmatprep.subr.bf16.mxu0 %v3028_v4  ;;  %2373 = vmatpush3.bf16.msra.mxu1 %v2587_v45  ;;  %v2633_v45 = vld [vmem:[#allocation11 + $0x4c] ss:$16 sps:$4 sm:$0xff]  }
 0x1eb   : > { %2374 = vmatprep.subr.bf16.mxu1 %v3028_v4 }
 0x1ed   : > { %2355 = vmatpush3.bf16.msra.mxu0 %v2580_v41  ;;  %v2627_v41 = vld [vmem:[#allocation11 + $0x6c] ss:$16 sps:$4 sm:$0xff]  }
 0x1ee   : > { %2356 = vmatprep.subr.bf16.mxu0 %v3028_v4  ;;  %2375 = vmatpush3.bf16.msra.mxu1 %v2588_v46  ;;  %v3030_v46 = vmov 0  }
 0x1ef   : > { %2376 = vmatprep.subr.bf16.mxu1 %v3028_v4 }
 0x1f1   : > { %2357 = vmatpush3.bf16.msra.mxu0 %v2581_v42  ;;  %v2622_v42 = vld [vmem:[#allocation11 + $0x60] ss:$16 sps:$4 sm:$0xff]  }
 0x1f2   : > { %2382 = vmatprep.subr.bf16.mxu0 %v3028_v4  ;;  %2377 = vmatpush3.bf16.msra.mxu1 %v2589_v47  ;;  %v2628_v47 = vld [vmem:[#allocation11 + $0x40] ss:$16 sps:$4 sm:$0xff]  }
 0x1f3   : > { %1330 = vmatprep.subr.bf16.mxu1 %v2600_v22  ;;  %v2663_v22 = vld [vmem:[#allocation13 + $0x58] sm:$0xff]  }
 0x1f4   : > { %2359 = vmatmul.mubr.bf16.vlgmr.msra.gmra.mxu0 %v660_v32  ;;  %v2612_v32 = vld [vmem:[#allocation11 + $0xa4] ss:$16 sps:$4 sm:$0xff]  }
 0x1f5   : > { %2398 = vmatprep.mubr.msk.bf16.mxu0 %vm3029_vm0, %v3028_v4  ;;  %2383 = vmatpush3.bf16.msra.mxu0 %v2590_v48  ;;  %v2631_v48 = vld [vmem:[#allocation11 + $0x48] ss:$16 sps:$4 sm:$0xff]  }
 0x1f6   : > { %2384 = vmatprep.subr.bf16.mxu0 %v3028_v4 }
 0x1f9   : > { %2385 = vmatpush3.bf16.msra.mxu0 %v2591_v49  ;;  %v2636_v49 = vld [vmem:[#allocation11 + $0x24] ss:$16 sps:$4 sm:$0xff]  }
 0x1fa   : > { %2386 = vmatprep.subr.bf16.mxu0 %v3028_v4 }
 0x1fd   : > { %2387 = vmatpush3.bf16.msra.mxu0 %v2592_v50  ;;  %v2639_v50 = vld [vmem:[#allocation11 + $0x2c] ss:$16 sps:$4 sm:$0xff]  }
 0x1fe   : > { %2388 = vmatprep.subr.bf16.mxu0 %v3028_v4 }
 0x201   : > { %2389 = vmatpush3.bf16.msra.mxu0 %v2593_v51  ;;  %v2634_v51 = vld [vmem:[#allocation11 + $0x20] ss:$16 sps:$4 sm:$0xff]  }
 0x202   : > { %2390 = vmatprep.subr.bf16.mxu0 %v3028_v4 }
 0x205   : > { %2391 = vmatpush3.bf16.msra.mxu0 %v2594_v52  ;;  %v2637_v52 = vld [vmem:[#allocation11 + $0x28] ss:$16 sps:$4 sm:$0xff]  }
 0x206   : > { %2392 = vmatprep.subr.bf16.mxu0 %v3028_v4 }
 0x209   : > { %2393 = vmatpush3.bf16.msra.mxu0 %v2595_v53  ;;  %v2642_v53 = vld [vmem:[#allocation11 + $0x4] ss:$16 sps:$4 sm:$0xff]  }
 0x20a   : > { %2394 = vmatprep.subr.bf16.mxu0 %v3028_v4 }
 0x20d   : > { %2395 = vmatpush3.bf16.msra.mxu0 %v2596_v54  ;;  %v2645_v54 = vld [vmem:[#allocation11 + $0xc] ss:$16 sps:$4 sm:$0xff]  }
 0x20e   : > { %2396 = vmatprep.subr.bf16.mxu0 %v3028_v4 }
 0x211   : > { %2397 = vmatpush3.bf16.msra.mxu0 %v2597_v8  ;;  %v2649_v8 = vld [vmem:[#allocation13 + $0x38] sm:$0xff]  }
 0x212   : > { %1531 = vmatprep.subr.bf16.mxu0 %v2603_v24  ;;  %v2665_v24 = vld [vmem:[#allocation13 + $0x18] sm:$0xff]  }
 0x294   : > { %v759_v55 = vpop.f32.mrf.mxu0  ;;  %v863_v56 = vpop.f32.mrf.mxu1 }
 0x295   : > { %v973_v57 = vmul.f32 %v863_v56, %v759_v55  ;;  %v2640_v55 = vld [vmem:[#allocation11] ss:$16 sps:$4 sm:$0xff]   ;;  %v2643_v56 = vld [vmem:[#allocation11 + $0x8] ss:$16 sps:$4 sm:$0xff]  }
 0x296   : > { %v2320_v58 = vpop.f32.mrf.mxu0  ;;  %v2340_v59 = vpop.f32.mrf.mxu1 }
 0x297   : > { %2680 = vtanh.f32 %v973_v57 }
 0x298   : > { %v762_v60 = vpop.f32.mrf.mxu0  ;;  %v866_v61 = vpop.f32.mrf.mxu1 }
 0x299   : > { %v2141_v61 = vld [vmem:[%s3528_s8] ss:$0 sm:$0xff]  ;;  %s629_s8 = scalar_lea.vmem [#allocation16], %s2089_s14  ;;  %s2908_s14 = scalar_lea.vmem %s2907_s27, 256 }
 0x29a   : > { %v2321_v62 = vpop.f32.mrf.mxu0  ;;  %v2341_v63 = vpop.f32.mrf.mxu1  ;;  %s1922_s21 = sshll.u32 %s629_s8, 4  ;;  %s1923_s21 = int_to_ptr.vmem [resolvable:$true] %s1922_s21 }
 0x29b   : > { %v2142_v63 = vld [vmem:[%s3529_s29] ss:$0 sm:$0xff]  ;;  %s2902_s15 = scalar_lea.vmem %s1923_s21, 128  ;;  %p2909_p13 = scmp.lt.s32.totalorder %s1923_s21, %s2907_s27 }
 0x29c   : > { %p2903_p1 = scmp.ne.s32.totalorder %s1923_s21, %s2902_s15  ;;  %p2910_p0 = scmp.lt.s32.totalorder %s2908_s14, %s2902_s15 }
 0x29e   : > { %p2904_p8 = pnand %p2903_p1, %p3535_p3  ;;  %p2911_p2 = por %p2910_p0, %p2909_p13 }
 0x2a0   : > { %p2905_p12 = pneg %p2904_p8 }
 0x2a2   : > { %p2912_p4 = pnand %p2911_p2, %p2905_p12 }
 0x2a4   : > { %v2681_v1 = vpop.eup %2680 }
 0x2a5   : > { %v975_v2 = vpack.c.bf16 %v2681_v1, %v2681_v1 }
 0x2a7   : > { %2379 = vmatmul.mubr.bf16.vlgmr.msra.gmra.mxu1 %v975_v2 }
 0x2a8   : > { %1331 = vmatpush1.bf16.msra.mxu1 %v2598_v21  ;;  %1362 = vmatprep.mubr.bf16.mxu1 %v3030_v46  ;;  %v2662_v21 = vld [vmem:[#allocation13 + $0xd8] sm:$0xff]  }
 0x2a9   : > { %1332 = vmatprep.subr.bf16.mxu1 %v2606_v25  ;;  %v2666_v25 = vld [vmem:[#allocation13 + $0xd0] sm:$0xff]  }
 0x2ac   : > { %1333 = vmatpush1.bf16.msra.mxu1 %v2604_v27  ;;  %v2668_v27 = vld [vmem:[#allocation13 + $0x90] sm:$0xff]  }
 0x2ad   : > { %1334 = vmatprep.subr.bf16.mxu1 %v2612_v32  ;;  %v2674_v32 = vld [vmem:[#allocation13 + $0xc0] sm:$0xff]  }
 0x2b0   : > { %1335 = vmatpush1.bf16.msra.mxu1 %v2610_v34  ;;  %v2676_v34 = vld [vmem:[#allocation13 + $0x80] sm:$0xff]  }
 0x2b1   : > { %1336 = vmatprep.subr.bf16.mxu1 %v2618_v37 }
 0x2b4   : > { %v967_v3 = vpop.f32.mrf.mxu0  ;;  %1337 = vmatpush1.bf16.msra.mxu1 %v2616_v36  ;;  %v1240_v36 = vlaneseq }
 0x2b5   : > { %1338 = vmatprep.subr.bf16.mxu1 %v2624_v40  ;;  %v1439_v40 = vld [vmem:[%s3530_s4 + $0x2] sm:$0x3] }
 0x2b6   : > { %v2360_v5 = vpop.f32.mrf.mxu0  ;;  %v1241_v37 = vshrl.u32 %v1240_v36, 7 }
 0x2b7   : > { %v2646_v5 = vld [vmem:[#allocation13 + $0xf8] sm:$0xff]  }
 0x2b8   : > { %v970_v6 = vpop.f32.mrf.mxu0  ;;  %1339 = vmatpush1.bf16.msra.mxu1 %v2622_v42 }
 0x2b9   : > { %1340 = vmatprep.subr.bf16.mxu1 %v2630_v44  ;;  %v2647_v6 = vld [vmem:[#allocation13 + $0x78] sm:$0xff]  }
 0x2ba   : > { %v2361_v7 = vpop.f32.mrf.mxu0 }
 0x2bb   : > { %v2648_v7 = vld [vmem:[#allocation13 + $0xb8] sm:$0xff]  }
 0x2bc   : > { %1341 = vmatpush1.bf16.msra.mxu1 %v2628_v47 }
 0x2bd   : > { %1342 = vmatprep.subr.bf16.mxu1 %v2636_v49 }
 0x2c0   : > { %1343 = vmatpush1.bf16.msra.mxu1 %v2634_v51 }
 0x2c1   : > { %1344 = vmatprep.subr.bf16.mxu1 %v2642_v53 }
 0x2c4   : > { %1345 = vmatpush1.bf16.msra.mxu1 %v2640_v55 }
 0x2c5   : > { %2258 = vmatprep.subr.bf16.mxu1 %v2646_v5 }
 0x367   : > { %v1074_v4 = vpop.f32.mrf.mxu1 }
 0x368   : > { %v1080_v9 = vmul.f32 %v1074_v4, %v967_v3  ;;  %v2650_v4 = vld [vmem:[#allocation13 + $0xf0] sm:$0xff]  }
 0x369   : > { %v2380_v10 = vpop.f32.mrf.mxu1 }
 0x36a   : > { %v1081_v11 = vpack.c.bf16 %v1080_v9, %v1080_v9  ;;  %v2651_v9 = vld [vmem:[#allocation13 + $0x70] sm:$0xff]  }
 0x36b   : > { %v1077_v12 = vpop.f32.mrf.mxu1  ;;  %v2652_v10 = vld [vmem:[#allocation13 + $0xb0] sm:$0xff]  }
 0x36c   : > { %2399 = vmatmul.mubr.bf16.vlgmr.msra.gmra.mxu0 %v1081_v11  ;;  %v2653_v11 = vld [vmem:[#allocation13 + $0x30] sm:$0xff]   ;;  %v2654_v12 = vld [vmem:[#allocation13 + $0xe8] sm:$0xff]  }
 0x36d   : > { %v2381_v13 = vpop.f32.mrf.mxu1  ;;  %1532 = vmatpush1.bf16.msra.mxu0 %v2601_v23  ;;  %1563 = vmatprep.mubr.bf16.mxu0 %v3030_v46  ;;  %v2664_v23 = vld [vmem:[#allocation13 + $0x98] sm:$0xff]  }
 0x36e   : > { %1533 = vmatprep.subr.bf16.mxu0 %v2609_v26  ;;  %v2655_v13 = vld [vmem:[#allocation13 + $0x68] sm:$0xff]   ;;  %v2667_v26 = vld [vmem:[#allocation13 + $0x50] sm:$0xff]  }
 0x371   : > { %1534 = vmatpush1.bf16.msra.mxu0 %v2607_v28  ;;  %v2669_v28 = vld [vmem:[#allocation13 + $0x10] sm:$0xff]  }
 0x372   : > { %1535 = vmatprep.subr.bf16.mxu0 %v2615_v33  ;;  %v2675_v33 = vld [vmem:[#allocation13 + $0x40] sm:$0xff]  }
 0x375   : > { %1536 = vmatpush1.bf16.msra.mxu0 %v2613_v35  ;;  %v2677_v35 = vld [vmem:[#allocation13] sm:$0xff]  }
 0x376   : > { %1537 = vmatprep.subr.bf16.mxu0 %v2621_v39  ;;  %v1238_v39 = vld [vmem:[%s3530_s4] sm:$0x3] }
 0x379   : > { %1538 = vmatpush1.bf16.msra.mxu0 %v2619_v38  ;;  %v1242_v38 = vsub.s32 0, %v1241_v37 }
 0x37a   : > { %1539 = vmatprep.subr.bf16.mxu0 %v2627_v41  ;;  %v1246_v41 = vsub.s32 1, %v1241_v37 }
 0x37b   : > { %v1243_v42 = vrot.slane %v1238_v39, %v1242_v38 }
 0x37c   : > { %v1247_v44 = vrot.slane %v1238_v39, %v1246_v41 }
 0x37d   : > { %1540 = vmatpush1.bf16.msra.mxu0 %v2625_v43  ;;  %v1444_v43 = vrot.slane %v1439_v40, %v1242_v38 }
 0x37e   : > { %1541 = vmatprep.subr.bf16.mxu0 %v2633_v45  ;;  %v1448_v45 = vrot.slane %v1439_v40, %v1246_v41 }
 0x381   : > { %1542 = vmatpush1.bf16.msra.mxu0 %v2631_v48 }
 0x382   : > { %1543 = vmatprep.subr.bf16.mxu0 %v2639_v50 }
 0x385   : > { %1544 = vmatpush1.bf16.msra.mxu0 %v2637_v52 }
 0x386   : > { %1545 = vmatprep.subr.bf16.mxu0 %v2645_v54 }
 0x389   : > { %1546 = vmatpush1.bf16.msra.mxu0 %v2643_v56 }
 0x38a   : > { %2280 = vmatprep.subr.bf16.mxu0 %v2647_v6 }
 0x42c   : > { %v1187_v15 = vpop.f32.mrf.mxu0 }
 0x42d   : > { %v1188_v16 = vadd.f32 %v2132_v14, %v1187_v15  ;;  %v2656_v14 = vld [vmem:[#allocation13 + $0xa8] sm:$0xff]  }
 0x42e   : > { %v2400_v17 = vpop.f32.mrf.mxu0  ;;  %v2657_v15 = vld [vmem:[#allocation13 + $0x28] sm:$0xff]  }
 0x42f   : > { %v3397_v18 = vadd.f32 %v1188_v16, %v3333_v0  ;;  %v2658_v16 = vld [vmem:[#allocation13 + $0xe0] sm:$0xff]  }
 0x430   : > { %v1190_v19 = vpop.f32.mrf.mxu0  ;;  %v2659_v17 = vld [vmem:[#allocation13 + $0x60] sm:$0xff]  }
 0x431   : > { %1196 = vadd.xlane.f32.xlu1 %v3397_v18  ;;  %v2660_v19 = vld [vmem:[#allocation13 + $0xa0] sm:$0xff]  }
 0x432   : > { %v2401_v20 = vpop.f32.mrf.mxu0 }
 0x433   : > { %v2661_v20 = vld [vmem:[#allocation13 + $0x20] sm:$0xff]  }
 0x4ba   : > { %v1197_v0 = vpop.xlane.xlu1 %1196 }
 0x4bb   : > { %v1198_v29 = vmul.f32 0.0078125, %v1197_v0  ;;  %v2670_v0 = vld [vmem:[#allocation13 + $0xc8] sm:$0xff]  }
 0x4bd   : > { %v1199_v30 = vsub.f32 %v3397_v18, %v1198_v29  ;;  %v2671_v29 = vld [vmem:[#allocation13 + $0x48] sm:$0xff]  }
 0x4bf   : > { %v1200_v31 = vmul.f32 %v1199_v30, %v1199_v30 }
 0x4c1   : > { %1201 = vadd.xlane.f32.xlu1 %v1200_v31  ;;  %v2673_v31 = vld [vmem:[#allocation13 + $0x8] sm:$0xff]  }
 0x54a   : > { %v1202_v57 = vpop.xlane.xlu1 %1201 }
 0x54b   : > { %v1203_v58 = vmul.f32 0.0078125, %v1202_v57 }
 0x54d   : > { %v1204_v59 = vadd.f32 1e-05, %v1203_v58 }
 0x54f   : > { %2682 = vrsqrt.f32 %v1204_v59 }
 0x55c   : > { %v2683_v60 = vpop.eup %2682 }
 0x55d   : > { %v1206_v62 = vmul.f32 %v2683_v60, %v1199_v30  ;;  %v2672_v30 = vld [vmem:[#allocation13 + $0x88] sm:$0xff]  }
 0x55f   : > { %v1213_v1 = vmul.f32 %v2141_v61, %v1206_v62 }
 0x561   : > { %v1220_v2 = vadd.f32 %v2142_v63, %v1213_v1 }
 0x563   : > { %v1221_v3 = vpack.c.bf16 %v1220_v2, %v1220_v2 }
 0x565   : > { %1363 = vmatmul.mubr.bf16.vlgmr.msra.gmra.mxu1 %v1221_v3  ;;  %1564 = vmatmul.mubr.bf16.vlgmr.msra.gmra.mxu0 %v1221_v3 }
 0x566   : > { %2259 = vmatpush3.bf16.msra.mxu1 %v2648_v7  ;;  %2281 = vmatpush3.bf16.msra.mxu0 %v2649_v8 }
 0x567   : > { %2260 = vmatprep.subr.bf16.mxu1 %v2650_v4  ;;  %2282 = vmatprep.subr.bf16.mxu0 %v2651_v9 }
 0x56a   : > { %2261 = vmatpush3.bf16.msra.mxu1 %v2652_v10  ;;  %2283 = vmatpush3.bf16.msra.mxu0 %v2653_v11 }
 0x56b   : > { %2262 = vmatprep.subr.bf16.mxu1 %v2654_v12  ;;  %2284 = vmatprep.subr.bf16.mxu0 %v2655_v13 }
 0x56e   : > { %2263 = vmatpush3.bf16.msra.mxu1 %v2656_v14  ;;  %2285 = vmatpush3.bf16.msra.mxu0 %v2657_v15 }
 0x56f   : > { %2264 = vmatprep.subr.bf16.mxu1 %v2658_v16  ;;  %2286 = vmatprep.subr.bf16.mxu0 %v2659_v17 }
 0x572   : > { %2265 = vmatpush3.bf16.msra.mxu1 %v2660_v19  ;;  %2287 = vmatpush3.bf16.msra.mxu0 %v2661_v20 }
 0x573   : > { %2266 = vmatprep.subr.bf16.mxu1 %v2662_v21  ;;  %2288 = vmatprep.subr.bf16.mxu0 %v2663_v22 }
 0x576   : > { %2267 = vmatpush3.bf16.msra.mxu1 %v2664_v23  ;;  %2289 = vmatpush3.bf16.msra.mxu0 %v2665_v24 }
 0x577   : > { %2268 = vmatprep.subr.bf16.mxu1 %v2666_v25  ;;  %2290 = vmatprep.subr.bf16.mxu0 %v2667_v26 }
 0x57a   : > { %2269 = vmatpush3.bf16.msra.mxu1 %v2668_v27  ;;  %2291 = vmatpush3.bf16.msra.mxu0 %v2669_v28 }
 0x57b   : > { %2270 = vmatprep.subr.bf16.mxu1 %v2670_v0  ;;  %2292 = vmatprep.subr.bf16.mxu0 %v2671_v29 }
 0x57e   : > { %2271 = vmatpush3.bf16.msra.mxu1 %v2672_v30  ;;  %2293 = vmatpush3.bf16.msra.mxu0 %v2673_v31 }
 0x57f   : > { %2272 = vmatprep.subr.bf16.mxu1 %v2674_v32  ;;  %2294 = vmatprep.subr.bf16.mxu0 %v2675_v33 }
 0x582   : > { %2273 = vmatpush3.bf16.msra.mxu1 %v2676_v34  ;;  %2295 = vmatpush3.bf16.msra.mxu0 %v2677_v35 }
 0x625   : > { %v1364_v46 = vpop.f32.mrf.mxu1  ;;  %v1565_v47 = vpop.f32.mrf.mxu0 }
 0x626   : > { %v1365_v48 = vadd.f32 %v1364_v46, %v1243_v42  ;;  %v1566_v49 = vadd.f32 %v1565_v47, %v1444_v43 }
 0x627   : > { %v1366_v50 = vpop.f32.mrf.mxu1  ;;  %v1567_v51 = vpop.f32.mrf.mxu0 }
 0x628   : > { %v1371_v52 = vmul.f32 %v1365_v48, %v1365_v48  ;;  %v1572_v53 = vmul.f32 %v1566_v49, %v1566_v49  ;;  %v1367_v54 = vadd.f32 %v1366_v50, %v1247_v44  ;;  %v1568_v55 = vadd.f32 %v1567_v51, %v1448_v45  ;;  %v2207_v45 = vld [vmem:[%s3533_s1] ss:$0 sm:$0xff] }
 0x629   : > { %v1368_v56 = vpop.f32.mrf.mxu1  ;;  %v1569_v57 = vpop.f32.mrf.mxu0 }
 0x62a   : > { %v1373_v58 = vmul.f32 %v1371_v52, %v1365_v48  ;;  %v1574_v59 = vmul.f32 %v1572_v53, %v1566_v49  ;;  %v1372_v60 = vmul.f32 %v1367_v54, %v1367_v54  ;;  %v1573_v61 = vmul.f32 %v1568_v55, %v1568_v55 }
 0x62b   : > { %v1369_v62 = vpop.f32.mrf.mxu1  ;;  %v1570_v63 = vpop.f32.mrf.mxu0 }
 0x62c   : > { %v1375_v1 = vmul.f32 0.044715, %v1373_v58  ;;  %v1576_v2 = vmul.f32 0.044715, %v1574_v59  ;;  %v1374_v3 = vmul.f32 %v1372_v60, %v1367_v54  ;;  %v1575_v5 = vmul.f32 %v1573_v61, %v1568_v55 }
 0x62e   : > { %v1377_v6 = vadd.f32 %v1375_v1, %v1365_v48  ;;  %v1578_v7 = vadd.f32 %v1576_v2, %v1566_v49  ;;  %v1376_v8 = vmul.f32 0.044715, %v1374_v3  ;;  %v1577_v4 = vmul.f32 0.044715, %v1575_v5 }
 0x630   : > { %v1379_v9 = vmul.f32 0.7978846, %v1377_v6  ;;  %v1580_v10 = vmul.f32 0.7978846, %v1578_v7  ;;  %v1378_v11 = vadd.f32 %v1376_v8, %v1367_v54  ;;  %v1579_v12 = vadd.f32 %v1577_v4, %v1568_v55 }
 0x632   : > { %2684 = vtanh.f32 %v1379_v9  ;;  %v1380_v13 = vmul.f32 0.7978846, %v1378_v11  ;;  %v1581_v14 = vmul.f32 0.7978846, %v1579_v12 }
 0x633   : > { %2686 = vtanh.f32 %v1580_v10 }
 0x634   : > { %2688 = vtanh.f32 %v1380_v13 }
 0x635   : > { %2690 = vtanh.f32 %v1581_v14 }
 0x63f   : > { %v2685_v15 = vpop.eup %2684 }
 0x640   : > { %v2687_v16 = vpop.eup %2686  ;;  %v1383_v17 = vadd.f32 1.0, %v2685_v15 }
 0x641   : > { %v2689_v19 = vpop.eup %2688  ;;  %v1584_v20 = vadd.f32 1.0, %v2687_v16 }
 0x642   : > { %v2691_v21 = vpop.eup %2690  ;;  %v1384_v22 = vadd.f32 1.0, %v2689_v19  ;;  %v1385_v23 = vmul.f32 0.5, %v1383_v17 }
 0x643   : > { %v1585_v24 = vadd.f32 1.0, %v2691_v21  ;;  %v1586_v25 = vmul.f32 0.5, %v1584_v20 }
 0x644   : > { %v1386_v26 = vmul.f32 0.5, %v1384_v22  ;;  %v1387_v28 = vmul.f32 %v1385_v23, %v1365_v48 }
 0x645   : > { %v1587_v27 = vmul.f32 0.5, %v1585_v24  ;;  %v1588_v29 = vmul.f32 %v1586_v25, %v1566_v49 }
 0x646   : > { %v1388_v0 = vmul.f32 %v1386_v26, %v1367_v54  ;;  %v1389_v33 = vpack.c.bf16 %v1387_v28, %v1387_v28 }
 0x647   : > { %v1589_v30 = vmul.f32 %v1587_v27, %v1568_v55  ;;  %v1590_v34 = vpack.c.bf16 %v1588_v29, %v1588_v29 }
 0x648   : > { %v1390_v31 = vpack.c.bf16 %v1388_v0, %v1388_v0 }
 0x649   : > { %v1591_v32 = vpack.c.bf16 %v1589_v30, %v1589_v30 }
 0x64a   : > { %1888 = vmatprep.mubr.bf16.mxu0 %v1390_v31 }
 0x64b   : > { %1752 = vmatprep.mubr.bf16.mxu1 %v1591_v32  ;;  %1889 = vmatmul.mubr.bf16.vlgmr.msra.gmra.mxu0 %v1389_v33 }
 0x64c   : > { %1753 = vmatmul.mubr.bf16.vlgmr.msra.gmra.mxu1 %v1590_v34 }
 0x70b   : > { %v2296_v35 = vpop.f32.mrf.mxu0 }
 0x70c   : > { %v2274_v36 = vpop.f32.mrf.mxu1 }
 0x70d   : > { %v2297_v37 = vpop.f32.mrf.mxu0 }
 0x70e   : > { %v2275_v38 = vpop.f32.mrf.mxu1  ;;  %v2298_v39 = vadd.f32 %v2297_v37, %v2296_v35 }
 0x70f   : > { %v2276_v40 = vadd.f32 %v2275_v38, %v2274_v36  ;;  %v2299_v41 = vpop.f32.mrf.mxu0 }
 0x710   : > { %v2277_v42 = vpop.f32.mrf.mxu1 }
 0x711   : > { %v1891_v43 = vadd.f32 %v2298_v39, %v2276_v40  ;;  %v2300_v44 = vpop.f32.mrf.mxu0 }
 0x712   : > { %v2278_v46 = vpop.f32.mrf.mxu1 }
 0x713   : > { %v1896_v47 = vadd.f32 %v1891_v43, %v3397_v18 }
 0x715   : > { %v1904_v48 = vadd.f32 %v2207_v45, %v1896_v47 }
 0x717   : > { %1905 = vst [vmem:[%s629_s8] sm:$0xff] %v1904_v48 }
 0x718   : > { %2915 = shalt.err (!%p2912_p4)
}
 0x719   : > { %s2916_s28 = scalar_lea.hbm %s1920_s3, 128  ;;  %s2920_s30 = scalar_lea.hbm %s3534_s2, 512 }
 0x71a   : > { %p2917_p7 = scmp.ne.s32.totalorder %s1920_s3, %s2916_s28  ;;  %p2921_p10 = scmp.lt.s32.totalorder %s1920_s3, %s3534_s2 }
 0x71b   : > { %p2922_p11 = scmp.lt.s32.totalorder %s2920_s30, %s2916_s28 }
 0x71c   : > { %p2918_p5 = pnand %p2917_p7, %p3535_p3 }
 0x71d   : > { %p2923_p6 = por %p2922_p11, %p2921_p10 }
 0x71e   : > { %p2919_p9 = pneg %p2918_p5 }
 0x720   : > { %p2924_p1 = pnand %p2923_p6, %p2919_p9 }
 0x722   : > { %2927 = shalt.err (!%p2924_p1)
}
 0x723   : > { %2432 = dma.vmem_to_hbm [thread:$0]  (%p3535_p3), %s1923_s21, 128, %s1920_s3, %s1907_s16  }
 0x724 PF: > { %s3536_s22 = sld [smem:[#allocation27_spill]]  ;;  %p2479_p8 = scmp.ge.s32.totalorder %s3014_s25, 2 }
 0x725   : > { %s1934_s8 = sand.u32 1, %s2986_s18  }
 0x726   : > { %s1935_s9 = scalar_lea.sflag [#allocation4], %s1934_s8 }
 0x72a   : > { %p3537_p12 = scmp.ne.s32.totalorder %s3536_s22, 0 }
 0x72c   : > { %p2461_p13 = pnand %p2479_p8, %p3537_p12 }
 0x72e   : > { %p2462_p0 = pneg %p2461_p13 }
 0x730   : > { %2981 = dma.done.wait (%p2462_p0), %s1935_s9, 128  }
 0x731   : > { %2983 = vsyncadd (%p2462_p0), %s1935_s9, 4294967168  ;;  %s35_s25 = sadd.s32 1, %s3014_s25   ;;  %s3538_s13 = sld [smem:[#allocation25_spill]] }
 0x732   : > { %p32_p2 = scmp.ge.s32.totalorder %s35_s25, 6   ;;  %s3539_s29 = sld [smem:[#allocation26_spill]] }
 0x733   : > { %s3540_s18 = smov %s2990_s19  ;;  %s3541_s19 = smov %s2994_s20 }
 0x734   : > { %s3542_s20 = smov %s3287_s11  ;;  %s3543_s21 = smov %s3006_s23 }
 0x735   : > { %s3544_s22 = smov %s3010_s24  ;;  %34 = sbr.rel (!%p32_p2) target bundleno = 24 (0x18), region = 153 }
 0x737   : > { %s3545_s23 = smov %s3538_s13 }
 0x738   : > { %s3546_s24 = smov %s3539_s29 }
 0x73a   :  { %1940 = vsyncpa [#allocation3], 1 }
 0x73b   :  { %1942 = vsyncpa [#allocation3 + $0x1], 1 }
 0x73c   :  { %1943 = vsyncpa [#allocation6], 1 }
 0x73d   :  { %1944 = vsyncpa [#allocation9], 1 }
 0x73e   :  { %1945 = vsyncpa [#allocation12], 1 }
 0x73f   :  { %1946 = vsyncpa [#allocation15], 1 }
 0x740   :  { %1947 = vsyncpa [#allocation4], 1 }
 0x741   :  { %1949 = vsyncpa [#allocation4 + $0x1], 1 }

</bundles_post_ra>
